<compile_context>
chip_gen: v7x
topology: tpu7x:2x2x1
jax: 0.10.0
libtpu: 0.0.40
codegen_flags: <defaults>
</compile_context>

<pallas_src>
import functools

import jax
import jax.numpy as jnp
from jax import lax
from jax.experimental import pallas as pl
from jax.experimental.pallas import tpu as pltpu


_NORM_EPS = 1e-12  # torch.nn.functional.normalize default eps


def _l2_normalize_rows(x):
    # x / max(||x||_2, eps)  ==  x * rsqrt(max(sum(x^2), eps^2))
    sq = jnp.sum(x * x, axis=-1, keepdims=True)
    return x * lax.rsqrt(jnp.maximum(sq, _NORM_EPS * _NORM_EPS))


def _round_up(v, m):
    return ((v + m - 1) // m) * m


# ----------------------------------------------------------------------------
# Fused single-pass kernel (preferred): streams adj once over E-tiles.
#   grid = (E_tiles,)  [reduction -> "arbitrary"]
#   xn and the [N, D] accumulator live in VMEM scratch for the whole grid.
# ----------------------------------------------------------------------------
def _fused_kernel(adj_ref, x_ref, o_ref, xn_ref, acc_ref):
    e = pl.program_id(0)

    @pl.when(e == 0)
    def _():
        xn_ref[...] = _l2_normalize_rows(x_ref[...].astype(jnp.float32))
        acc_ref[...] = jnp.zeros_like(acc_ref)

    a = adj_ref[...].astype(jnp.float32)                    # (te, N)
    # edge_embeddings tile: (te, D)
    edge = jnp.dot(a, xn_ref[...], preferred_element_type=jnp.float32)
    # edge2node partial: adj_tile^T @ edge  ->  (N, D), contraction over te
    acc_ref[...] += lax.dot_general(
        a, edge,
        dimension_numbers=(((0,), (0,)), ((), ())),
        preferred_element_type=jnp.float32)

    @pl.when(e == pl.num_programs(0) - 1)
    def _():
        o_ref[...] = _l2_normalize_rows(acc_ref[...]).astype(o_ref.dtype)


def _fused_forward(adj_p, x_p, te):
    e_pad, n_pad = adj_p.shape
    d_pad = x_p.shape[1]
    return pl.pallas_call(
        _fused_kernel,
        out_shape=jax.ShapeDtypeStruct((n_pad, d_pad), jnp.float32),
        grid_spec=pltpu.PrefetchScalarGridSpec(
            num_scalar_prefetch=0,
            grid=(e_pad // te,),
            in_specs=[
                pl.BlockSpec((te, n_pad), lambda e: (e, 0)),     # adj E-tile
                pl.BlockSpec((n_pad, d_pad), lambda e: (0, 0)),  # x (resident)
            ],
            out_specs=pl.BlockSpec((n_pad, d_pad), lambda e: (0, 0)),
            scratch_shapes=[
                pltpu.VMEM((n_pad, d_pad), jnp.float32),  # xn
                pltpu.VMEM((n_pad, d_pad), jnp.float32),  # accumulator
            ],
        ),
        compiler_params=pltpu.CompilerParams(
            dimension_semantics=("arbitrary",),
            vmem_limit_bytes=40 * 1024 * 1024),
    )(adj_p, x_p)


# ----------------------------------------------------------------------------
# Fallback kernel 1: edge_embeddings = adj @ normalize(x)   (normalize fused)
#   grid = (E_tiles [parallel], N_tiles [reduction])
# ----------------------------------------------------------------------------
def _edge_aggregate_kernel(adj_ref, x_ref, o_ref, acc_ref):
    k = pl.program_id(1)

    @pl.when(k == 0)
    def _():
        acc_ref[...] = jnp.zeros_like(acc_ref)

    # Full feature dim is in the block, so per-row normalization is exact.
    x_n = _l2_normalize_rows(x_ref[...].astype(jnp.float32))
    acc_ref[...] += jnp.dot(adj_ref[...].astype(jnp.float32), x_n,
                            preferred_element_type=jnp.float32)

    @pl.when(k == pl.num_programs(1) - 1)
    def _():
        o_ref[...] = acc_ref[...].astype(o_ref.dtype)


# ----------------------------------------------------------------------------
# Fallback kernel 2: edge2node = normalize(adj^T @ edge_embeddings)
#   grid = (N_tiles [parallel], E_tiles [reduction]); adj loaded untransposed,
#   contraction over its leading (E) dim on the MXU.
# ----------------------------------------------------------------------------
def _node_aggregate_kernel(adj_ref, e_ref, o_ref, acc_ref):
    k = pl.program_id(1)

    @pl.when(k == 0)
    def _():
        acc_ref[...] = jnp.zeros_like(acc_ref)

    acc_ref[...] += lax.dot_general(
        adj_ref[...].astype(jnp.float32), e_ref[...].astype(jnp.float32),
        dimension_numbers=(((0,), (0,)), ((), ())),
        preferred_element_type=jnp.float32)

    @pl.when(k == pl.num_programs(1) - 1)
    def _():
        o_ref[...] = _l2_normalize_rows(acc_ref[...]).astype(o_ref.dtype)


def _edge_aggregate(adj, x, te, tn):
    e_pad, n_pad = adj.shape
    d = x.shape[1]
    return pl.pallas_call(
        _edge_aggregate_kernel,
        out_shape=jax.ShapeDtypeStruct((e_pad, d), jnp.float32),
        grid_spec=pltpu.PrefetchScalarGridSpec(
            num_scalar_prefetch=0,
            grid=(e_pad // te, n_pad // tn),
            in_specs=[
                pl.BlockSpec((te, tn), lambda i, k: (i, k)),   # adj tile
                pl.BlockSpec((tn, d), lambda i, k: (k, 0)),    # node feature tile
            ],
            out_specs=pl.BlockSpec((te, d), lambda i, k: (i, 0)),
            scratch_shapes=[pltpu.VMEM((te, d), jnp.float32)],
        ),
        compiler_params=pltpu.CompilerParams(
            dimension_semantics=("parallel", "arbitrary")),
    )(adj, x)


def _node_aggregate(adj, edge_emb, te, tn):
    e_pad, n_pad = adj.shape
    d = edge_emb.shape[1]
    return pl.pallas_call(
        _node_aggregate_kernel,
        out_shape=jax.ShapeDtypeStruct((n_pad, d), jnp.float32),
        grid_spec=pltpu.PrefetchScalarGridSpec(
            num_scalar_prefetch=0,
            grid=(n_pad // tn, e_pad // te),
            in_specs=[
                pl.BlockSpec((te, tn), lambda j, k: (k, j)),   # adj tile (E, N)
                pl.BlockSpec((te, d), lambda j, k: (k, 0)),    # edge embedding tile
            ],
            out_specs=pl.BlockSpec((tn, d), lambda j, k: (j, 0)),
            scratch_shapes=[pltpu.VMEM((tn, d), jnp.float32)],
        ),
        compiler_params=pltpu.CompilerParams(
            dimension_semantics=("parallel", "arbitrary")),
    )(adj, edge_emb)


# ----------------------------------------------------------------------------
# Top-level forward
# ----------------------------------------------------------------------------
@functools.partial(jax.jit, static_argnames=("force_two_pass",))
def hypergraph_attention_forward(item_embeddings, adj, *, force_two_pass=False):
    """HyperGraphAttentionLayerSparse.forward.

    item_embeddings: [1, N, D] or [N, D]; adj: [E, N] hyperedge incidence.
    Returns edge2node: [N, D].
    """
    x = item_embeddings
    if x.ndim == 3:  # squeeze(dim=0)
        x = x.reshape(x.shape[-2], x.shape[-1])
    n, d = x.shape
    e = adj.shape[0]

    d_pad = _round_up(d, 128)     # lane-dense feature slab
    n_pad_f = _round_up(n, 128)   # adj lane dim for the fused path

    # VMEM budget for the fused single-pass kernel (conservative: safe on v7x's
    # 64 MiB VMEM and well under v5e/v6e 128 MiB).  Estimate:
    #   2x double-buffered adj tile (te, N) + 2x x block + 2x out block
    #   + xn scratch + acc scratch.
    budget = 28 * 1024 * 1024
    fixed_bytes = 6 * n_pad_f * d_pad * 4
    te_fused = 0
    if fixed_bytes + 2 * 8 * n_pad_f * 4 <= budget:
        te_max = (budget - fixed_bytes) // (2 * n_pad_f * 4)
        te_fused = min(512, (te_max // 8) * 8)
    use_fused = (not force_two_pass) and te_fused >= 8

    if use_fused:
        te = min(te_fused, _round_up(e, 8))
        e_pad = _round_up(e, te)
        n_pad = n_pad_f
        x_p = jnp.pad(x.astype(jnp.float32), ((0, n_pad - n), (0, d_pad - d)))
        adj_p = jnp.pad(adj.astype(jnp.float32),
                        ((0, e_pad - e), (0, n_pad - n)))
        out = _fused_forward(adj_p, x_p, te)      # adj read from HBM once
        return out[:n, :d]

    # Two-pass fallback for very large node counts: large tiles, reduction
    # axis last, row axis parallel (megacore).
    tn = min(512, _round_up(n, 128))
    te = min(512, _round_up(e, 8))
    n_pad = _round_up(n, tn)
    e_pad = _round_up(e, te)
    x_p = jnp.pad(x.astype(jnp.float32), ((0, n_pad - n), (0, d_pad - d)))
    adj_p = jnp.pad(adj.astype(jnp.float32), ((0, e_pad - e), (0, n_pad - n)))

    edge_emb = _edge_aggregate(adj_p, x_p, te, tn)         # [E_pad, D_pad]
    edge2node = _node_aggregate(adj_p, edge_emb, te, tn)   # [N_pad, D_pad]
    return edge2node[:n, :d]
    # TODO(synk): for extremely sparse adj, a scalar-prefetch gather kernel over
    # the edge list would beat this dense-incidence matmul.


# ----------------------------------------------------------------------------
# Pure-JAX reference (for correctness check)
# ----------------------------------------------------------------------------
def _reference_forward(item_embeddings, adj):
    x = item_embeddings
    if x.ndim == 3:
        x = x.reshape(x.shape[-2], x.shape[-1])
    xn = _l2_normalize_rows(x.astype(jnp.float32))
    edge = adj.astype(jnp.float32) @ xn
    node = adj.astype(jnp.float32).T @ edge
    return _l2_normalize_rows(node)


# ----------------------------------------------------------------------------
if __name__ == "__main__":
    IN_FEATURES = 128   # feature dim D (lane-dense)
    N_NODES = 200       # deliberately unaligned -> exercises the padding path
    N_EDGES = 300       # number of hyperedges

    root = jax.random.PRNGKey(0)
    k_x, k_adj = jax.random.split(root)

    item_embeddings = jax.random.normal(
        k_x, (1, N_NODES, IN_FEATURES), jnp.float32)
    # hyperedge incidence matrix adj[e, n] in {0, 1}, ~5% dense
    adj = (jax.random.uniform(k_adj, (N_EDGES, N_NODES)) < 0.05).astype(jnp.float32)

    ref = _reference_forward(item_embeddings, adj)

    # Fused single-pass path (default for this size).
    out = jax.block_until_ready(
        hypergraph_attention_forward(item_embeddings, adj))
    assert out.shape == (N_NODES, IN_FEATURES)
    assert bool(jnp.all(jnp.isfinite(out)))
    assert bool(jnp.allclose(out, ref, atol=2e-5, rtol=2e-5))

    # Two-pass fallback path (used for very large N) — also verified.
    out2 = jax.block_until_ready(
        hypergraph_attention_forward(item_embeddings, adj, force_two_pass=True))
    assert out2.shape == (N_NODES, IN_FEATURES)
    assert bool(jnp.all(jnp.isfinite(out2)))
    assert bool(jnp.allclose(out2, ref, atol=2e-5, rtol=2e-5))

    print("KERNEL_OK")
</pallas_src>

<mosaic_0001>
module attributes {stable_mosaic.version = 11 : i64} {
  func.func @_fused_kernel(%arg0: i32, %arg1: memref<304x256xf32, #tpu.memory_space<vmem>>, %arg2: memref<256x128xf32, #tpu.memory_space<vmem>>, %arg3: memref<256x128xf32, #tpu.memory_space<vmem>>, %arg4: memref<256x128xf32, #tpu.memory_space<vmem>>, %arg5: memref<256x128xf32, #tpu.memory_space<vmem>>) attributes {dimension_semantics = [#tpu.dimension_semantics<arbitrary>], iteration_bounds = array<i64: 1>, scalar_prefetch = 0 : i64, scratch_operands = 2 : i64, tpu.core_type = #tpu.core_type<tc>, window_params = [{transform_indices = @transform_0, window_bounds = array<i64: 304, 256>}, {pipeline_mode = #tpu.pipeline_mode<synchronous>, transform_indices = @transform_1, window_bounds = array<i64: 256, 128>}, {pipeline_mode = #tpu.pipeline_mode<synchronous>, transform_indices = @transform_2, window_bounds = array<i64: 256, 128>}]} {
    %c0_i32 = arith.constant 0 : i32
    %0 = arith.cmpi eq, %arg0, %c0_i32 : i32
    %1 = arith.extui %0 : i1 to i32
    %c0_i32_0 = arith.constant 0 : i32
    %2 = arith.cmpi ne, %1, %c0_i32_0 : i32
    scf.if %2 {
      %c0_11 = arith.constant 0 : index
      %c0_12 = arith.constant 0 : index
      %13 = vector.load %arg2[%c0_11, %c0_12] : memref<256x128xf32, #tpu.memory_space<vmem>>, vector<256x128xf32>
      %14 = arith.mulf %13, %13 : vector<256x128xf32>
      %cst_13 = arith.constant dense<0.000000e+00> : vector<256xf32>
      %15 = vector.multi_reduction <add>, %14, %cst_13 [1] : vector<256x128xf32> to vector<256xf32>
      %16 = vector.shape_cast %15 : vector<256xf32> to vector<256x1xf32>
      %cst_14 = arith.constant 1.000000e-24 : f32
      %17 = vector.broadcast %cst_14 : f32 to vector<256x1xf32>
      %18 = arith.maximumf %16, %17 : vector<256x1xf32>
      %19 = math.rsqrt %18 : vector<256x1xf32>
      %20 = vector.broadcast %19 : vector<256x1xf32> to vector<256x128xf32>
      %21 = arith.mulf %13, %20 : vector<256x128xf32>
      %c0_15 = arith.constant 0 : index
      %c0_16 = arith.constant 0 : index
      %22 = vector.load %arg4[%c0_15, %c0_16] : memref<256x128xf32, #tpu.memory_space<vmem>>, vector<256x128xf32>
      tpu.vector_store %arg4[%c0_15, %c0_16], %21 {strides = array<i32>} : memref<256x128xf32, #tpu.memory_space<vmem>>, vector<256x128xf32>,
      %cst_17 = arith.constant 0.000000e+00 : f32
      %23 = vector.broadcast %cst_17 : f32 to vector<256x128xf32>
      %c0_18 = arith.constant 0 : index
      %c0_19 = arith.constant 0 : index
      %24 = vector.load %arg5[%c0_18, %c0_19] : memref<256x128xf32, #tpu.memory_space<vmem>>, vector<256x128xf32>
      tpu.vector_store %arg5[%c0_18, %c0_19], %23 {strides = array<i32>} : memref<256x128xf32, #tpu.memory_space<vmem>>, vector<256x128xf32>,
    } else {
    }
    %c0 = arith.constant 0 : index
    %c0_1 = arith.constant 0 : index
    %3 = vector.load %arg1[%c0, %c0_1] : memref<304x256xf32, #tpu.memory_space<vmem>>, vector<304x256xf32>
    %c0_2 = arith.constant 0 : index
    %c0_3 = arith.constant 0 : index
    %4 = vector.load %arg4[%c0_2, %c0_3] : memref<256x128xf32, #tpu.memory_space<vmem>>, vector<256x128xf32>
    %cst = arith.constant dense<0.000000e+00> : vector<304x128xf32>
    %5 = tpu.matmul %3, %4, %cst {dimension_numbers = #tpu.dot_dimension_numbers<[1], [0], [0], [1], [0, 0, 1, 1], [], []>} : vector<304x256xf32>, vector<256x128xf32>, vector<304x128xf32> -> vector<304x128xf32>
    %c0_4 = arith.constant 0 : index
    %c0_5 = arith.constant 0 : index
    %6 = vector.load %arg5[%c0_4, %c0_5] : memref<256x128xf32, #tpu.memory_space<vmem>>, vector<256x128xf32>
    %cst_6 = arith.constant dense<0.000000e+00> : vector<256x128xf32>
    %7 = tpu.matmul %3, %5, %cst_6 {dimension_numbers = #tpu.dot_dimension_numbers<[0], [0], [1], [1], [0, 1, 1, 1], [], []>} : vector<304x256xf32>, vector<304x128xf32>, vector<256x128xf32> -> vector<256x128xf32>
    %8 = arith.addf %6, %7 : vector<256x128xf32>
    %c0_7 = arith.constant 0 : index
    %c0_8 = arith.constant 0 : index
    %9 = vector.load %arg5[%c0_7, %c0_8] : memref<256x128xf32, #tpu.memory_space<vmem>>, vector<256x128xf32>
    tpu.vector_store %arg5[%c0_7, %c0_8], %8 {strides = array<i32>} : memref<256x128xf32, #tpu.memory_space<vmem>>, vector<256x128xf32>,
    %c0_i32_9 = arith.constant 0 : i32
    %10 = arith.cmpi eq, %arg0, %c0_i32_9 : i32
    %11 = arith.extui %10 : i1 to i32
    %c0_i32_10 = arith.constant 0 : i32
    %12 = arith.cmpi ne, %11, %c0_i32_10 : i32
    scf.if %12 {
      %c0_11 = arith.constant 0 : index
      %c0_12 = arith.constant 0 : index
      %13 = vector.load %arg5[%c0_11, %c0_12] : memref<256x128xf32, #tpu.memory_space<vmem>>, vector<256x128xf32>
      %14 = arith.mulf %13, %13 : vector<256x128xf32>
      %cst_13 = arith.constant dense<0.000000e+00> : vector<256xf32>
      %15 = vector.multi_reduction <add>, %14, %cst_13 [1] : vector<256x128xf32> to vector<256xf32>
      %16 = vector.shape_cast %15 : vector<256xf32> to vector<256x1xf32>
      %cst_14 = arith.constant 1.000000e-24 : f32
      %17 = vector.broadcast %cst_14 : f32 to vector<256x1xf32>
      %18 = arith.maximumf %16, %17 : vector<256x1xf32>
      %19 = math.rsqrt %18 : vector<256x1xf32>
      %20 = vector.broadcast %19 : vector<256x1xf32> to vector<256x128xf32>
      %21 = arith.mulf %13, %20 : vector<256x128xf32>
      %c0_15 = arith.constant 0 : index
      %c0_16 = arith.constant 0 : index
      %22 = vector.load %arg3[%c0_15, %c0_16] : memref<256x128xf32, #tpu.memory_space<vmem>>, vector<256x128xf32>
      tpu.vector_store %arg3[%c0_15, %c0_16], %21 {strides = array<i32>} : memref<256x128xf32, #tpu.memory_space<vmem>>, vector<256x128xf32>,
    } else {
    }
    return
  }
  func.func @transform_0(%arg0: i32) -> (i32, i32) {
    %c0_i32 = arith.constant 0 : i32
    %c0_i32_0 = arith.constant 0 : i32
    return %arg0, %c0_i32 : i32, i32
  }
  func.func @transform_1(%arg0: i32) -> (i32, i32) {
    %c0_i32 = arith.constant 0 : i32
    %c0_i32_0 = arith.constant 0 : i32
    %c0_i32_1 = arith.constant 0 : i32
    return %c0_i32, %c0_i32_0 : i32, i32
  }
  func.func @transform_2(%arg0: i32) -> (i32, i32) {
    %c0_i32 = arith.constant 0 : i32
    %c0_i32_0 = arith.constant 0 : i32
    %c0_i32_1 = arith.constant 0 : i32
    return %c0_i32, %c0_i32_0 : i32, i32
  }
}

</mosaic_0001>

<bundles_post_ra>
// kernel: hypergraph_attention_forward.1
= control target key start
LH: loop header
LB: loop body
LE: loop exit
PB: predicated region body
PF: predicated region fallthrough
CT: control target
= control target key end

     0   :  { %v2388_v42 = vmov 0.0|0.0   ;;  %vm890_vm0 = vcmask 392192   ;;  %s3610_s1 = inlined_call_operand.vmem [shape: f32[256,128], index: 1, kind: input, shape index: {}]   ;;  %s3611_s0 = inlined_call_operand.vmem [shape: f32[304,256], index: 0, kind: input, shape index: {}]   ;;  %s3612_s2 = inlined_call_operand.vmem [shape: f32[256,128], index: 2, kind: output, shape index: {}]  }
   0x1   :  { %v2407_v0 = vld [vmem:[%s3610_s1 + $0x10] sm:$0xff]  ;;  %v2412_v1 = vld [vmem:[%s3610_s1] sm:$0xff]  ;;  %v2417_v2 = vld [vmem:[%s3610_s1 + $0x18] sm:$0xff]  ;;  %1894 = vmatprep.subr.bf16.mxu0 %v2388_v42  ;;  %2002 = vmatprep.subr.bf16.mxu1 %v2388_v42 }
   0x2   :  { %v49_v3 = vmul.f32 %v2407_v0, %v2407_v0  ;;  %v47_v4 = vmul.f32 %v2412_v1, %v2412_v1  ;;  %v2426_v5 = vld [vmem:[%s3610_s1 + $0x8] sm:$0xff]  ;;  %v50_v6 = vmul.f32 %v2417_v2, %v2417_v2  ;;  %v2440_v9 = vld [vmem:[%s3610_s1 + $0x20] sm:$0xff]  ;;  %v2449_v12 = vld [vmem:[%s3610_s1 + $0x38] sm:$0xff] }
   0x3   :  { %v48_v7 = vmul.f32 %v2426_v5, %v2426_v5  ;;  %v2435_v8 = vld [vmem:[%s3610_s1 + $0x28] sm:$0xff]  ;;  %v51_v11 = vmul.f32 %v2440_v9, %v2440_v9  ;;  %v2454_v13 = vld [vmem:[%s3610_s1 + $0x30] sm:$0xff]  ;;  %v54_v14 = vmul.f32 %v2449_v12, %v2449_v12  ;;  %v2468_v17 = vld [vmem:[%s3610_s1 + $0x40] sm:$0xff] }
   0x4   :  { %83 = vadd.xlane.f32.xlu1 %v49_v3  ;;  %79 = vadd.xlane.f32.xlu0 %v47_v4  ;;  %v52_v10 = vmul.f32 %v2435_v8, %v2435_v8  ;;  %v53_v15 = vmul.f32 %v2454_v13, %v2454_v13  ;;  %v2463_v16 = vld [vmem:[%s3610_s1 + $0x48] sm:$0xff]  ;;  %v55_v19 = vmul.f32 %v2468_v17, %v2468_v17  ;;  %v2477_v20 = vld [vmem:[%s3610_s1 + $0x58] sm:$0xff]  ;;  %v2482_v21 = vld [vmem:[%s3610_s1 + $0x50] sm:$0xff] }
   0x5   :  { %v56_v18 = vmul.f32 %v2463_v16, %v2463_v16  ;;  %v58_v22 = vmul.f32 %v2477_v20, %v2477_v20  ;;  %v57_v23 = vmul.f32 %v2482_v21, %v2482_v21  ;;  %v2491_v24 = vld [vmem:[%s3610_s1 + $0x68] sm:$0xff]  ;;  %v2496_v25 = vld [vmem:[%s3610_s1 + $0x60] sm:$0xff]  ;;  %v2505_v28 = vld [vmem:[%s3610_s1 + $0x78] sm:$0xff] }
   0x6   :  { %v60_v26 = vmul.f32 %v2491_v24, %v2491_v24  ;;  %v59_v27 = vmul.f32 %v2496_v25, %v2496_v25  ;;  %v2510_v29 = vld [vmem:[%s3610_s1 + $0x70] sm:$0xff]  ;;  %v62_v30 = vmul.f32 %v2505_v28, %v2505_v28  ;;  %v2519_v32 = vld [vmem:[%s3610_s1 + $0x88] sm:$0xff]  ;;  %v2524_v33 = vld [vmem:[%s3610_s1 + $0x80] sm:$0xff] }
   0x7   :  { %v61_v31 = vmul.f32 %v2510_v29, %v2510_v29  ;;  %v64_v34 = vmul.f32 %v2519_v32, %v2519_v32  ;;  %v63_v35 = vmul.f32 %v2524_v33, %v2524_v33  ;;  %v2533_v36 = vld [vmem:[%s3610_s1 + $0x98] sm:$0xff]  ;;  %v2538_v37 = vld [vmem:[%s3610_s1 + $0x90] sm:$0xff]  ;;  %v2547_v40 = vld [vmem:[%s3610_s1 + $0xa8] sm:$0xff] }
   0x8   :  { %85 = vadd.xlane.f32.xlu1 %v50_v6  ;;  %81 = vadd.xlane.f32.xlu0 %v48_v7  ;;  %v66_v38 = vmul.f32 %v2533_v36, %v2533_v36  ;;  %v65_v39 = vmul.f32 %v2538_v37, %v2538_v37  ;;  %v2552_v41 = vld [vmem:[%s3610_s1 + $0xa0] sm:$0xff]  ;;  %v68_v43 = vmul.f32 %v2547_v40, %v2547_v40  ;;  %v2563_v45 = vld [vmem:[%s3610_s1 + $0xb8] sm:$0xff]  ;;  %v2568_v46 = vld [vmem:[%s3610_s1 + $0xb0] sm:$0xff] }
   0x9   :  { %v67_v44 = vmul.f32 %v2552_v41, %v2552_v41  ;;  %v70_v47 = vmul.f32 %v2563_v45, %v2563_v45  ;;  %v69_v48 = vmul.f32 %v2568_v46, %v2568_v46  ;;  %v2577_v49 = vld [vmem:[%s3610_s1 + $0xc8] sm:$0xff]  ;;  %v2582_v50 = vld [vmem:[%s3610_s1 + $0xc0] sm:$0xff]  ;;  %v2591_v53 = vld [vmem:[%s3610_s1 + $0xd8] sm:$0xff] }
   0xa   :  { %v72_v51 = vmul.f32 %v2577_v49, %v2577_v49  ;;  %v71_v52 = vmul.f32 %v2582_v50, %v2582_v50  ;;  %v2596_v54 = vld [vmem:[%s3610_s1 + $0xd0] sm:$0xff]  ;;  %v74_v55 = vmul.f32 %v2591_v53, %v2591_v53  ;;  %v2605_v57 = vld [vmem:[%s3610_s1 + $0xe8] sm:$0xff]  ;;  %v2610_v58 = vld [vmem:[%s3610_s1 + $0xe0] sm:$0xff] }
   0xb   :  { %v73_v56 = vmul.f32 %v2596_v54, %v2596_v54  ;;  %v76_v59 = vmul.f32 %v2605_v57, %v2605_v57  ;;  %v75_v60 = vmul.f32 %v2610_v58, %v2610_v58  ;;  %v2619_v61 = vld [vmem:[%s3610_s1 + $0xf8] sm:$0xff]  ;;  %v2624_v62 = vld [vmem:[%s3610_s1 + $0xf0] sm:$0xff]  ;;  %v2633_v4 = vld [vmem:[%s3611_s0 + $0x8] sm:$0xff] }
   0xc   :  { %89 = vadd.xlane.f32.xlu1 %v52_v10  ;;  %87 = vadd.xlane.f32.xlu0 %v51_v11  ;;  %v78_v63 = vmul.f32 %v2619_v61, %v2619_v61  ;;  %v77_v3 = vmul.f32 %v2624_v62, %v2624_v62 }
   0xd   :  { %475 = vmatprep.mubr.f32.mxu0 %v2633_v4 }
  0x10   :  { %93 = vadd.xlane.f32.xlu1 %v54_v14  ;;  %91 = vadd.xlane.f32.xlu0 %v53_v15 }
  0x14   :  { %97 = vadd.xlane.f32.xlu1 %v56_v18  ;;  %95 = vadd.xlane.f32.xlu0 %v55_v19 }
  0x18   :  { %101 = vadd.xlane.f32.xlu1 %v58_v22  ;;  %99 = vadd.xlane.f32.xlu0 %v57_v23 }
  0x1c   :  { %105 = vadd.xlane.f32.xlu1 %v60_v26  ;;  %103 = vadd.xlane.f32.xlu0 %v59_v27 }
  0x20   :  { %109 = vadd.xlane.f32.xlu1 %v62_v30  ;;  %107 = vadd.xlane.f32.xlu0 %v61_v31 }
  0x24   :  { %113 = vadd.xlane.f32.xlu1 %v64_v34  ;;  %111 = vadd.xlane.f32.xlu0 %v63_v35 }
  0x28   :  { %117 = vadd.xlane.f32.xlu1 %v66_v38  ;;  %115 = vadd.xlane.f32.xlu0 %v65_v39 }
  0x2c   :  { %121 = vadd.xlane.f32.xlu1 %v68_v43  ;;  %119 = vadd.xlane.f32.xlu0 %v67_v44 }
  0x30   :  { %125 = vadd.xlane.f32.xlu1 %v70_v47  ;;  %123 = vadd.xlane.f32.xlu0 %v69_v48 }
  0x34   :  { %129 = vadd.xlane.f32.xlu1 %v72_v51  ;;  %127 = vadd.xlane.f32.xlu0 %v71_v52 }
  0x38   :  { %133 = vadd.xlane.f32.xlu1 %v74_v55  ;;  %131 = vadd.xlane.f32.xlu0 %v73_v56 }
  0x3c   :  { %137 = vadd.xlane.f32.xlu1 %v76_v59  ;;  %135 = vadd.xlane.f32.xlu0 %v75_v60 }
  0x40   :  { %141 = vadd.xlane.f32.xlu1 %v78_v63  ;;  %139 = vadd.xlane.f32.xlu0 %v77_v3 }
  0x91   :  { %v84_v6 = vpop.xlane.xlu1 %83  ;;  %v80_v7 = vpop.xlane.xlu0 %79 }
  0x92   :  { %v145_v10 = vmax.f32 %v84_v6, 1e-24  ;;  %v143_v11 = vmax.f32 %v80_v7, 1e-24 }
  0x94   :  { %2260 = vrsqrt.f32 %v145_v10 }
  0x95   :  { %v86_v14 = vpop.xlane.xlu1 %85  ;;  %v82_v15 = vpop.xlane.xlu0 %81  ;;  %2262 = vrsqrt.f32 %v143_v11 }
  0x96   :  { %v146_v18 = vmax.f32 %v86_v14, 1e-24  ;;  %v144_v19 = vmax.f32 %v82_v15, 1e-24 }
  0x98   :  { %2264 = vrsqrt.f32 %v146_v18 }
  0x99   :  { %2266 = vrsqrt.f32 %v144_v19  ;;  %v90_v22 = vpop.xlane.xlu1 %89  ;;  %v88_v23 = vpop.xlane.xlu0 %87 }
  0x9a   :  { %v148_v26 = vmax.f32 %v90_v22, 1e-24  ;;  %v147_v27 = vmax.f32 %v88_v23, 1e-24 }
  0x9c   :  { %2268 = vrsqrt.f32 %v148_v26 }
  0x9d   :  { %2270 = vrsqrt.f32 %v147_v27  ;;  %v94_v30 = vpop.xlane.xlu1 %93  ;;  %v92_v31 = vpop.xlane.xlu0 %91 }
  0x9e   :  { %v150_v34 = vmax.f32 %v94_v30, 1e-24  ;;  %v149_v35 = vmax.f32 %v92_v31, 1e-24  ;;  %v2261_v38 = vpop.eup %2260 }
  0x9f   :  { %v2263_v39 = vpop.eup %2262  ;;  %v209_v63 = vmul.f32 %v2261_v38, %v2407_v0 }
  0xa0   :  { %2272 = vrsqrt.f32 %v150_v34  ;;  %v207_v55 = vmul.f32 %v2263_v39, %v2412_v1 }
  0xa1   :  { %2274 = vrsqrt.f32 %v149_v35  ;;  %v98_v43 = vpop.xlane.xlu1 %97  ;;  %v96_v44 = vpop.xlane.xlu0 %95 }
  0xa2   :  { %v2265_v47 = vpop.eup %2264  ;;  %v152_v48 = vmax.f32 %v98_v43, 1e-24  ;;  %v151_v51 = vmax.f32 %v96_v44, 1e-24 }
  0xa3   :  { %v2267_v52 = vpop.eup %2266  ;;  %v210_v11 = vmul.f32 %v2265_v47, %v2417_v2 }
  0xa4   :  { %2276 = vrsqrt.f32 %v152_v48  ;;  %v208_v56 = vmul.f32 %v2267_v52, %v2426_v5 }
  0xa5   :  { %2278 = vrsqrt.f32 %v151_v51  ;;  %v102_v59 = vpop.xlane.xlu1 %101  ;;  %v100_v60 = vpop.xlane.xlu0 %99  ;;  %v1898_v0 = vpack.c.bf16 %v210_v11, %v209_v63 }
  0xa6   :  { %v2269_v3 = vpop.eup %2268  ;;  %v1895_v6 = vpack.c.bf16 %v208_v56, %v207_v55  ;;  %v154_v7 = vmax.f32 %v102_v59, 1e-24  ;;  %v153_v10 = vmax.f32 %v100_v60, 1e-24 }
  0xa7   :  { %v2271_v14 = vpop.eup %2270  ;;  %v212_v1 = vmul.f32 %v2269_v3, %v2435_v8 }
  0xa8   :  { %1896 = vmatpush1.bf16.msra.mxu0 %v1895_v6  ;;  %2280 = vrsqrt.f32 %v154_v7  ;;  %v211_v15 = vmul.f32 %v2271_v14, %v2440_v9 }
  0xa9   :  { %2282 = vrsqrt.f32 %v153_v10  ;;  %1897 = vmatprep.subr.bf16.mxu0 %v2388_v42  ;;  %v106_v5 = vpop.xlane.xlu1 %105  ;;  %v104_v18 = vpop.xlane.xlu0 %103 }
  0xaa   :  { %v2273_v19 = vpop.eup %2272  ;;  %v156_v22 = vmax.f32 %v106_v5, 1e-24  ;;  %v155_v23 = vmax.f32 %v104_v18, 1e-24  ;;  %v1901_v2 = vpack.c.bf16 %v212_v1, %v211_v15 }
  0xab   :  { %v2275_v26 = vpop.eup %2274  ;;  %v214_v30 = vmul.f32 %v2273_v19, %v2449_v12 }
  0xac   :  { %1899 = vmatpush1.bf16.msra.mxu0 %v1898_v0  ;;  %2284 = vrsqrt.f32 %v156_v22  ;;  %v213_v27 = vmul.f32 %v2275_v26, %v2454_v13 }
  0xad   :  { %2286 = vrsqrt.f32 %v155_v23  ;;  %1900 = vmatprep.subr.bf16.mxu0 %v2388_v42  ;;  %v110_v8 = vpop.xlane.xlu1 %109  ;;  %v108_v9 = vpop.xlane.xlu0 %107 }
  0xae   :  { %v2277_v31 = vpop.eup %2276  ;;  %v158_v34 = vmax.f32 %v110_v8, 1e-24  ;;  %v157_v35 = vmax.f32 %v108_v9, 1e-24  ;;  %v1904_v39 = vpack.c.bf16 %v214_v30, %v213_v27 }
  0xaf   :  { %v2279_v38 = vpop.eup %2278  ;;  %v216_v44 = vmul.f32 %v2277_v31, %v2463_v16 }
  0xb0   :  { %1902 = vmatpush1.bf16.msra.mxu0 %v1901_v2  ;;  %2288 = vrsqrt.f32 %v158_v34  ;;  %v215_v43 = vmul.f32 %v2279_v38, %v2468_v17 }
  0xb1   :  { %2290 = vrsqrt.f32 %v157_v35  ;;  %1903 = vmatprep.subr.bf16.mxu0 %v2388_v42  ;;  %v114_v12 = vpop.xlane.xlu1 %113  ;;  %v112_v13 = vpop.xlane.xlu0 %111 }
  0xb2   :  { %v2281_v47 = vpop.eup %2280  ;;  %v160_v48 = vmax.f32 %v114_v12, 1e-24  ;;  %v159_v51 = vmax.f32 %v112_v13, 1e-24  ;;  %v1907_v55 = vpack.c.bf16 %v216_v44, %v215_v43 }
  0xb3   :  { %v2283_v52 = vpop.eup %2282  ;;  %v218_v59 = vmul.f32 %v2281_v47, %v2477_v20 }
  0xb4   :  { %1905 = vmatpush1.bf16.msra.mxu0 %v1904_v39  ;;  %2292 = vrsqrt.f32 %v160_v48  ;;  %v217_v56 = vmul.f32 %v2283_v52, %v2482_v21 }
  0xb5   :  { %2294 = vrsqrt.f32 %v159_v51  ;;  %1906 = vmatprep.subr.bf16.mxu0 %v2388_v42  ;;  %v118_v16 = vpop.xlane.xlu1 %117  ;;  %v116_v17 = vpop.xlane.xlu0 %115 }
  0xb6   :  { %v2285_v60 = vpop.eup %2284  ;;  %v162_v63 = vmax.f32 %v118_v16, 1e-24  ;;  %v161_v3 = vmax.f32 %v116_v17, 1e-24  ;;  %v1910_v7 = vpack.c.bf16 %v218_v59, %v217_v56 }
  0xb7   :  { %v2287_v6 = vpop.eup %2286  ;;  %v220_v11 = vmul.f32 %v2285_v60, %v2491_v24 }
  0xb8   :  { %1908 = vmatpush1.bf16.msra.mxu0 %v1907_v55  ;;  %2296 = vrsqrt.f32 %v162_v63  ;;  %v219_v10 = vmul.f32 %v2287_v6, %v2496_v25 }
  0xb9   :  { %2298 = vrsqrt.f32 %v161_v3  ;;  %1909 = vmatprep.subr.bf16.mxu0 %v2388_v42  ;;  %v122_v20 = vpop.xlane.xlu1 %121  ;;  %v120_v21 = vpop.xlane.xlu0 %119 }
  0xba   :  { %v2289_v14 = vpop.eup %2288  ;;  %v164_v15 = vmax.f32 %v122_v20, 1e-24  ;;  %v163_v1 = vmax.f32 %v120_v21, 1e-24  ;;  %v1913_v18 = vpack.c.bf16 %v220_v11, %v219_v10 }
  0xbb   :  { %v2291_v5 = vpop.eup %2290  ;;  %v222_v0 = vmul.f32 %v2289_v14, %v2505_v28 }
  0xbc   :  { %1911 = vmatpush1.bf16.msra.mxu0 %v1910_v7  ;;  %2300 = vrsqrt.f32 %v164_v15  ;;  %v221_v19 = vmul.f32 %v2291_v5, %v2510_v29 }
  0xbd   :  { %2302 = vrsqrt.f32 %v163_v1  ;;  %1912 = vmatprep.subr.bf16.mxu0 %v2388_v42  ;;  %v126_v24 = vpop.xlane.xlu1 %125  ;;  %v124_v25 = vpop.xlane.xlu0 %123 }
  0xbe   :  { %v2293_v22 = vpop.eup %2292  ;;  %v166_v23 = vmax.f32 %v126_v24, 1e-24  ;;  %v165_v26 = vmax.f32 %v124_v25, 1e-24  ;;  %v1916_v27 = vpack.c.bf16 %v222_v0, %v221_v19 }
  0xbf   :  { %v2295_v2 = vpop.eup %2294  ;;  %v224_v8 = vmul.f32 %v2293_v22, %v2519_v32 }
  0xc0   :  { %1914 = vmatpush1.bf16.msra.mxu0 %v1913_v18  ;;  %2304 = vrsqrt.f32 %v166_v23  ;;  %v223_v30 = vmul.f32 %v2295_v2, %v2524_v33  ;;  %v307_v23 = vld [vmem:[%s3611_s0 + $0x20] sm:$0xff]  ;;  %v309_v2 = vld [vmem:[%s3611_s0 + $0x30] sm:$0xff] }
  0xc1   :  { %2306 = vrsqrt.f32 %v165_v26  ;;  %1915 = vmatprep.subr.bf16.mxu0 %v2388_v42  ;;  %v130_v28 = vpop.xlane.xlu1 %129  ;;  %v128_v29 = vpop.xlane.xlu0 %127  ;;  %v2708_v26 = vld [vmem:[%s3611_s0 + $0x38] sm:$0xff] }
  0xc2   :  { %v2297_v9 = vpop.eup %2296  ;;  %v168_v31 = vmax.f32 %v130_v28, 1e-24  ;;  %v167_v34 = vmax.f32 %v128_v29, 1e-24  ;;  %v1919_v38 = vpack.c.bf16 %v224_v8, %v223_v30  ;;  %v2722_v30 = vld [vmem:[%s3611_s0 + $0x100] sm:$0xff]  ;;  %v2732_v29 = vld [vmem:[%s3611_s0 + $0x110] sm:$0xff] }
  0xc3   :  { %v2299_v35 = vpop.eup %2298  ;;  %v226_v43 = vmul.f32 %v2297_v9, %v2533_v36  ;;  %v311_v28 = vld [vmem:[%s3611_s0 + $0x40] sm:$0xff]  ;;  %v2737_v9 = vld [vmem:[%s3611_s0 + $0x58] sm:$0xff] }
  0xc4   :  { %1917 = vmatpush1.bf16.msra.mxu0 %v1916_v27  ;;  %2308 = vrsqrt.f32 %v168_v31  ;;  %v225_v39 = vmul.f32 %v2299_v35, %v2538_v37  ;;  %v2717_v27 = vld [vmem:[%s3611_s0 + $0x48] sm:$0xff]  ;;  %v2747_v35 = vld [vmem:[%s3611_s0 + $0x120] sm:$0xff] }
  0xc5   :  { %2310 = vrsqrt.f32 %v167_v34  ;;  %1918 = vmatprep.subr.bf16.mxu0 %v2388_v42  ;;  %v134_v32 = vpop.xlane.xlu1 %133  ;;  %v132_v33 = vpop.xlane.xlu0 %131  ;;  %v313_v34 = vld [vmem:[%s3611_s0 + $0x50] sm:$0xff] }
  0xc6   :  { %v2301_v44 = vpop.eup %2300  ;;  %v170_v12 = vmax.f32 %v134_v32, 1e-24  ;;  %v169_v13 = vmax.f32 %v132_v33, 1e-24  ;;  %v1922_v48 = vpack.c.bf16 %v226_v43, %v225_v39  ;;  %v2040_v39 = vpack.i.bf16 %v307_v23, %v2747_v35  ;;  %v315_v43 = vld [vmem:[%s3611_s0 + $0x60] sm:$0xff]  ;;  %v2762_v32 = vld [vmem:[%s3611_s0 + $0x130] sm:$0xff] }
  0xc7   :  { %v2303_v47 = vpop.eup %2302  ;;  %v228_v52 = vmul.f32 %v2301_v44, %v2547_v40  ;;  %v2767_v33 = vld [vmem:[%s3611_s0 + $0x78] sm:$0xff]  ;;  %v2042_v44 = vpack.i.bf16 %v309_v2, %v2762_v32 }
  0xc8   :  { %1920 = vmatpush1.bf16.msra.mxu0 %v1919_v38  ;;  %2312 = vrsqrt.f32 %v170_v12  ;;  %v227_v51 = vmul.f32 %v2303_v47, %v2552_v41  ;;  %v2752_v38 = vld [vmem:[%s3611_s0 + $0x68] sm:$0xff]  ;;  %v317_v12 = vld [vmem:[%s3611_s0 + $0x70] sm:$0xff] }
  0xc9   :  { %2314 = vrsqrt.f32 %v169_v13  ;;  %1921 = vmatprep.subr.bf16.mxu0 %v2388_v42  ;;  %v138_v36 = vpop.xlane.xlu1 %137  ;;  %v136_v37 = vpop.xlane.xlu0 %135  ;;  %v2777_v13 = vld [vmem:[%s3611_s0 + $0x140] sm:$0xff]  ;;  %v2782_v47 = vld [vmem:[%s3611_s0 + $0x88] sm:$0xff] }
  0xca   :  { %v2305_v55 = vpop.eup %2304  ;;  %v172_v56 = vmax.f32 %v138_v36, 1e-24  ;;  %v171_v59 = vmax.f32 %v136_v37, 1e-24  ;;  %v1925_v17 = vpack.c.bf16 %v228_v52, %v227_v51  ;;  %v319_v51 = vld [vmem:[%s3611_s0 + $0x80] sm:$0xff]  ;;  %v2792_v52 = vld [vmem:[%s3611_s0 + $0x150] sm:$0xff] }
  0xcb   :  { %v2307_v16 = vpop.eup %2306  ;;  %v230_v63 = vmul.f32 %v2305_v55, %v2563_v45  ;;  %v2797_v36 = vld [vmem:[%s3611_s0 + $0x98] sm:$0xff]  ;;  %v2046_v37 = vpack.i.bf16 %v313_v34, %v2792_v52  ;;  %v321_v55 = vld [vmem:[%s3611_s0 + $0x90] sm:$0xff] }
  0xcc   :  { %1923 = vmatpush1.bf16.msra.mxu0 %v1922_v48  ;;  %2316 = vrsqrt.f32 %v172_v56  ;;  %v229_v60 = vmul.f32 %v2307_v16, %v2568_v46  ;;  %v2044_v48 = vpack.i.bf16 %v311_v28, %v2777_v13  ;;  %v2807_v56 = vld [vmem:[%s3611_s0 + $0x160] sm:$0xff] }
  0xcd   :  { %2318 = vrsqrt.f32 %v171_v59  ;;  %1924 = vmatprep.subr.bf16.mxu0 %v2388_v42  ;;  %v142_v40 = vpop.xlane.xlu1 %141  ;;  %v140_v41 = vpop.xlane.xlu0 %139  ;;  %v2812_v59 = vld [vmem:[%s3611_s0 + $0xa8] sm:$0xff]  ;;  %v2048_v16 = vpack.i.bf16 %v315_v43, %v2807_v56 }
  0xce   :  { %v2309_v3 = vpop.eup %2308  ;;  %v174_v6 = vmax.f32 %v142_v40, 1e-24  ;;  %v173_v7 = vmax.f32 %v140_v41, 1e-24  ;;  %v1928_v11 = vpack.c.bf16 %v230_v63, %v229_v60  ;;  %v2822_v60 = vld [vmem:[%s3611_s0 + $0x170] sm:$0xff]  ;;  %v2827_v63 = vld [vmem:[%s3611_s0 + $0xb8] sm:$0xff] }
  0xcf   :  { %v2311_v10 = vpop.eup %2310  ;;  %v232_v21 = vmul.f32 %v2309_v3, %v2577_v49  ;;  %v2050_v40 = vpack.i.bf16 %v317_v12, %v2822_v60  ;;  %v325_v41 = vld [vmem:[%s3611_s0 + $0xb0] sm:$0xff]  ;;  %v2837_v3 = vld [vmem:[%s3611_s0 + $0x180] sm:$0xff] }
  0xd0   :  { %1926 = vmatpush1.bf16.msra.mxu0 %v1925_v17  ;;  %2320 = vrsqrt.f32 %v174_v6  ;;  %v231_v20 = vmul.f32 %v2311_v10, %v2582_v50  ;;  %v323_v17 = vld [vmem:[%s3611_s0 + $0xa0] sm:$0xff]  ;;  %v2842_v6 = vld [vmem:[%s3611_s0 + $0xc8] sm:$0xff] }
  0xd1   :  { %2322 = vrsqrt.f32 %v173_v7  ;;  %1927 = vmatprep.subr.bf16.mxu0 %v2388_v42  ;;  %v2052_v7 = vpack.i.bf16 %v319_v51, %v2837_v3  ;;  %v327_v10 = vld [vmem:[%s3611_s0 + $0xc0] sm:$0xff] }
  0xd2   :  { %v2313_v45 = vpop.eup %2312  ;;  %v1931_v14 = vpack.c.bf16 %v232_v21, %v231_v20  ;;  %v2857_v20 = vld [vmem:[%s3611_s0 + $0xd8] sm:$0xff] }
  0xd3   :  { %v2315_v46 = vpop.eup %2314  ;;  %v234_v1 = vmul.f32 %v2313_v45, %v2591_v53  ;;  %v329_v45 = vld [vmem:[%s3611_s0 + $0xd0] sm:$0xff] }
  0xd4   :  { %1929 = vmatpush1.bf16.msra.mxu0 %v1928_v11  ;;  %v233_v15 = vmul.f32 %v2315_v46, %v2596_v54  ;;  %v2852_v11 = vld [vmem:[%s3611_s0 + $0x190] sm:$0xff]  ;;  %v2867_v46 = vld [vmem:[%s3611_s0 + $0x1a0] sm:$0xff] }
  0xd5   :  { %1930 = vmatprep.subr.bf16.mxu0 %v2388_v42  ;;  %v2054_v21 = vpack.i.bf16 %v321_v55, %v2852_v11 }
  0xd6   :  { %v2317_v5 = vpop.eup %2316  ;;  %v1934_v19 = vpack.c.bf16 %v234_v1, %v233_v15  ;;  %v2056_v15 = vpack.i.bf16 %v323_v17, %v2867_v46  ;;  %v331_v1 = vld [vmem:[%s3611_s0 + $0xe0] sm:$0xff] }
  0xd7   :  { %v2319_v18 = vpop.eup %2318  ;;  %v236_v49 = vmul.f32 %v2317_v5, %v2605_v57  ;;  %v303_v57 = vld [vmem:[%s3611_s0] sm:$0xff]  ;;  %v2882_v5 = vld [vmem:[%s3611_s0 + $0x1b0] sm:$0xff] }
  0xd8   :  { %1932 = vmatpush1.bf16.msra.mxu0 %v1931_v14  ;;  %v235_v50 = vmul.f32 %v2319_v18, %v2610_v58  ;;  %v2689_v58 = vld [vmem:[%s3611_s0 + $0x18] sm:$0xff]  ;;  %v2036_v8 = vpack.i.bf16 %v303_v57, %v2722_v30  ;;  %v2872_v14 = vld [vmem:[%s3611_s0 + $0xe8] sm:$0xff] }
  0xd9   :  { %1933 = vmatprep.subr.bf16.mxu0 %v2388_v42  ;;  %v2887_v18 = vld [vmem:[%s3611_s0 + $0xf8] sm:$0xff] }
  0xda   :  { %v2321_v0 = vpop.eup %2320  ;;  %v1937_v25 = vpack.c.bf16 %v236_v49, %v235_v50  ;;  %2037 = vxpose.xlu0.b32.start [1/16] %v2036_v8, 128  ;;  %v333_v50 = vld [vmem:[%s3611_s0 + $0xf0] sm:$0xff]  ;;  %v2897_v49 = vld [vmem:[%s3611_s0 + $0x1c0] sm:$0xff]  ;;  %v2939_v8 = vld [vmem:[%s3611_s0 + $0x148] sm:$0xff] }
  0xdb   :  { %v2323_v24 = vpop.eup %2322  ;;  %v238_v53 = vmul.f32 %v2321_v0, %v2619_v61  ;;  %v305_v61 = vld [vmem:[%s3611_s0 + $0x10] sm:$0xff]  ;;  %v2902_v0 = vld [vmem:[%s3611_s0 + $0x108] sm:$0xff] }
  0xdc   :  { %1935 = vmatpush1.bf16.msra.mxu0 %v1934_v19  ;;  %v237_v54 = vmul.f32 %v2323_v24, %v2624_v62  ;;  %v2699_v62 = vld [vmem:[%s3611_s0 + $0x28] sm:$0xff]  ;;  %v2038_v31 = vpack.i.bf16 %v305_v61, %v2732_v29  ;;  %v2058_v19 = vpack.i.bf16 %v325_v41, %v2882_v5  ;;  %v2060_v24 = vpack.i.bf16 %v327_v10, %v2897_v49 }
  0xdd   :  { %1936 = vmatprep.subr.bf16.mxu0 %v2388_v42 }
  0xde   :  { %v1940_v22 = vpack.c.bf16 %v238_v53, %v237_v54  ;;  %2039 = vxpose.xlu0.b32.cont [2/16] %v2038_v31, 128  ;;  %v2912_v54 = vld [vmem:[%s3611_s0 + $0x118] sm:$0xff]  ;;  %v369_v31 = vld [vmem:[%s3611_s0 + $0x210] sm:$0xff] }
  0xe0   :  { %1938 = vmatpush1.bf16.msra.mxu0 %v1937_v25  ;;  %v361_v25 = vld [vmem:[%s3611_s0 + $0x1d0] sm:$0xff] }
  0xe1   :  { %1939 = vmatprep.subr.bf16.mxu0 %v2388_v42  ;;  %v2062_v53 = vpack.i.bf16 %v329_v45, %v361_v25 }
  0xe2   :  { %2041 = vxpose.xlu0.b32.cont [3/16] %v2040_v39, 128  ;;  %v2969_v39 = vld [vmem:[%s3611_s0 + $0x178] sm:$0xff] }
  0xe4   :  { %1941 = vmatpush1.bf16.msra.mxu0 %v1940_v22  ;;  %v363_v22 = vld [vmem:[%s3611_s0 + $0x1e0] sm:$0xff] }
  0xe5   :  { %1942 = vmatprep.subr.bf16.mxu0 %v2388_v42 }
  0xe6   :  { %2043 = vxpose.xlu0.b32.cont [4/16] %v2042_v44, 128  ;;  %v375_v44 = vld [vmem:[%s3611_s0 + $0x240] sm:$0xff] }
  0xe7   :  { %476 = vmatmul.mubr.f32.vlgmr.msra.gmra.mrb[0].mxu0 %v303_v57  ;;  %v2922_v57 = vld [vmem:[%s3611_s0 + $0x128] sm:$0xff] }
  0xe8   :  { %480 = vmatprep.mubr.f32.mxu0 %v2689_v58 }
  0xea   :  { %2045 = vxpose.xlu0.b32.cont [5/16] %v2044_v48, 128  ;;  %v356_v48 = vld [vmem:[%s3611_s0 + $0x1a8] sm:$0xff] }
  0xeb   :  { %481 = vmatmul.mubr.f32.gmra.mrb[2].mxu0 %v305_v61  ;;  %v2064_v61 = vpack.i.bf16 %v331_v1, %v363_v22 }
  0xec   :  { %485 = vmatprep.mubr.f32.mxu0 %v2699_v62 }
  0xee   :  { %2047 = vxpose.xlu0.b32.cont [6/16] %v2046_v37, 128  ;;  %v362_v37 = vld [vmem:[%s3611_s0 + $0x1d8] sm:$0xff] }
  0xef   :  { %486 = vmatmul.mubr.f32.gmra.mrb[4].mxu0 %v307_v23  ;;  %v365_v23 = vld [vmem:[%s3611_s0 + $0x1f0] sm:$0xff] }
  0xf0   :  { %490 = vmatprep.mubr.f32.mxu0 %v2708_v26 }
  0xf2   :  { %2049 = vxpose.xlu0.b32.cont [7/16] %v2048_v16, 128  ;;  %v368_v16 = vld [vmem:[%s3611_s0 + $0x208] sm:$0xff] }
  0xf3   :  { %491 = vmatmul.mubr.f32.gmra.mrb[6].mxu0 %v309_v2  ;;  %v2932_v2 = vld [vmem:[%s3611_s0 + $0x138] sm:$0xff] }
  0xf4   :  { %495 = vmatprep.mubr.f32.mxu0 %v2717_v27 }
  0xf6   :  { %2051 = vxpose.xlu0.b32.cont [8/16] %v2050_v40, 128  ;;  %v370_v40 = vld [vmem:[%s3611_s0 + $0x218] sm:$0xff] }
  0xf7   :  { %496 = vmatmul.mubr.f32.gmra.mrb[8].mxu0 %v311_v28  ;;  %v367_v28 = vld [vmem:[%s3611_s0 + $0x200] sm:$0xff] }
  0xf8   :  { %500 = vmatprep.mubr.f32.mxu0 %v2737_v9 }
  0xfa   :  { %2053 = vxpose.xlu0.b32.cont [9/16] %v2052_v7, 128  ;;  %v376_v7 = vld [vmem:[%s3611_s0 + $0x248] sm:$0xff] }
  0xfb   :  { %501 = vmatmul.mubr.f32.gmra.mrb[10].mxu0 %v313_v34  ;;  %v2959_v34 = vld [vmem:[%s3611_s0 + $0x168] sm:$0xff] }
  0xfc   :  { %505 = vmatprep.mubr.f32.mxu0 %v2752_v38 }
  0xfe   :  { %2055 = vxpose.xlu0.b32.cont [10/16] %v2054_v21, 128 }
  0xff   :  { %506 = vmatmul.mubr.f32.gmra.mrb[12].mxu0 %v315_v43  ;;  %v373_v43 = vld [vmem:[%s3611_s0 + $0x230] sm:$0xff] }
 0x100   :  { %510 = vmatprep.mubr.f32.mxu0 %v2767_v33 }
 0x102   :  { %2057 = vxpose.xlu0.b32.cont [11/16] %v2056_v15, 128 }
 0x103   :  { %511 = vmatmul.mubr.f32.gmra.mrb[14].mxu0 %v317_v12  ;;  %v2989_v12 = vld [vmem:[%s3611_s0 + $0x198] sm:$0xff] }
 0x104   :  { %515 = vmatprep.mubr.f32.mxu0 %v2782_v47  ;;  %v2166_v21 = vpack.i.bf16 %v2797_v36, %v2989_v12 }
 0x106   :  { %2059 = vxpose.xlu0.b32.cont [12/16] %v2058_v19, 128 }
 0x107   :  { %516 = vmatmul.mubr.f32.gmra.mrb[16].mxu0 %v319_v51  ;;  %v358_v51 = vld [vmem:[%s3611_s0 + $0x1b8] sm:$0xff] }
 0x108   :  { %520 = vmatprep.mubr.f32.mxu0 %v2797_v36 }
 0x10a   :  { %2061 = vxpose.xlu0.b32.cont [13/16] %v2060_v24, 128 }
 0x10b   :  { %521 = vmatmul.mubr.f32.gmra.mrb[18].mxu0 %v321_v55  ;;  %v364_v55 = vld [vmem:[%s3611_s0 + $0x1e8] sm:$0xff] }
 0x10c   :  { %525 = vmatprep.mubr.f32.mxu0 %v2812_v59  ;;  %v2176_v15 = vpack.i.bf16 %v2872_v14, %v364_v55 }
 0x10e   :  { %2063 = vxpose.xlu0.b32.cont [14/16] %v2062_v53, 128 }
 0x10f   :  { %526 = vmatmul.mubr.f32.gmra.mrb[20].mxu0 %v323_v17  ;;  %v2148_v17 = vpack.i.bf16 %v2633_v4, %v2902_v0  ;;  %v372_v4 = vld [vmem:[%s3611_s0 + $0x228] sm:$0xff] }
 0x110   :  { %530 = vmatprep.mubr.f32.mxu0 %v2827_v63 }
 0x111   :  { %2149 = vxpose.xlu1.b32.start [1/16] %v2148_v17, 128 }
 0x112   :  { %2065 = vxpose.xlu0.b32.cont [15/16] %v2064_v61, 128 }
 0x113   :  { %531 = vmatmul.mubr.f32.gmra.mrb[22].mxu0 %v325_v41  ;;  %v2152_v41 = vpack.i.bf16 %v2699_v62, %v2922_v57  ;;  %v2156_v62 = vpack.i.bf16 %v2717_v27, %v2939_v8  ;;  %v2160_v27 = vpack.i.bf16 %v2752_v38, %v2959_v34  ;;  %v2170_v38 = vpack.i.bf16 %v2827_v63, %v358_v51 }
 0x114   :  { %535 = vmatprep.mubr.f32.mxu0 %v2842_v6 }
 0x117   :  { %536 = vmatmul.mubr.f32.gmra.mrb[24].mxu0 %v327_v10  ;;  %v378_v10 = vld [vmem:[%s3611_s0 + $0x258] sm:$0xff] }
 0x118   :  { %540 = vmatprep.mubr.f32.mxu0 %v2857_v20 }
 0x11b   :  { %541 = vmatmul.mubr.f32.gmra.mrb[26].mxu0 %v329_v45  ;;  %v2168_v45 = vpack.i.bf16 %v2812_v59, %v356_v48 }
 0x11c   :  { %545 = vmatprep.mubr.f32.mxu0 %v2872_v14 }
 0x11f   :  { %546 = vmatmul.mubr.f32.gmra.mrb[28].mxu0 %v331_v1 }
 0x120   :  { %550 = vmatprep.mubr.f32.mxu0 %v2887_v18 }
 0x123   :  { %551 = vmatmul.mubr.f32.gmra.mrb[30].mxu0 %v333_v50 }
 0x124   :  { %555 = vmatprep.mubr.f32.mxu0 %v2902_v0 }
 0x127   :  { %556 = vmatmul.mubr.f32.gmra.mrb[32].mxu0 %v2722_v30  ;;  %v2066_v30 = vpack.i.bf16 %v333_v50, %v365_v23 }
 0x128   :  { %560 = vmatprep.mubr.f32.mxu0 %v2912_v54 }
 0x129   :  { %2067 = vxpose.xlu0.b32.end [16/16] %v2066_v30, 128 }
 0x12b   :  { %561 = vmatmul.mubr.f32.gmra.mrb[34].mxu0 %v2732_v29  ;;  %v2949_v29 = vld [vmem:[%s3611_s0 + $0x158] sm:$0xff] }
 0x12c   :  { %565 = vmatprep.mubr.f32.mxu0 %v2922_v57 }
 0x12d   :  { %826 = vxpose.xlu0.b32.start [1/6] (short) %v367_v28, 128 }
 0x12f   :  { %566 = vmatmul.mubr.f32.gmra.mrb[36].mxu0 %v2747_v35  ;;  %v371_v35 = vld [vmem:[%s3611_s0 + $0x220] sm:$0xff] }
 0x130   :  { %570 = vmatprep.mubr.f32.mxu0 %v2932_v2 }
 0x131   :  { %827 = vxpose.xlu0.b32.cont [2/6] (short) %v369_v31, 128 }
 0x133   :  { %571 = vmatmul.mubr.f32.gmra.mrb[38].mxu0 %v2762_v32  ;;  %v2979_v32 = vld [vmem:[%s3611_s0 + $0x188] sm:$0xff] }
 0x134   :  { %575 = vmatprep.mubr.f32.mxu0 %v2939_v8 }
 0x135   :  { %828 = vxpose.xlu0.b32.cont [3/6] (short) %v371_v35, 128 }
 0x137   :  { %576 = vmatmul.mubr.f32.gmra.mrb[40].mxu0 %v2777_v13  ;;  %v377_v13 = vld [vmem:[%s3611_s0 + $0x250] sm:$0xff] }
 0x138   :  { %580 = vmatprep.mubr.f32.mxu0 %v2949_v29 }
 0x139   :  { %829 = vxpose.xlu0.b32.cont [4/6] (short) %v373_v43, 128 }
 0x13b   :  { %581 = vmatmul.mubr.f32.gmra.mrb[42].mxu0 %v2792_v52  ;;  %v360_v52 = vld [vmem:[%s3611_s0 + $0x1c8] sm:$0xff] }
 0x13c   :  { %585 = vmatprep.mubr.f32.mxu0 %v2959_v34 }
 0x13d   :  { %830 = vxpose.xlu0.b32.cont [5/6] (short) %v375_v44, 128 }
 0x13f   :  { %586 = vmatmul.mubr.f32.gmra.mrb[44].mxu0 %v2807_v56  ;;  %v366_v56 = vld [vmem:[%s3611_s0 + $0x1f8] sm:$0xff] }
 0x140   :  { %590 = vmatprep.mubr.f32.mxu0 %v2969_v39 }
 0x141   :  { %831 = vxpose.xlu0.b32.end [6/6] (short) %v377_v13, 128 }
 0x143   :  { %591 = vmatmul.mubr.f32.gmra.mrb[46].mxu0 %v2822_v60  ;;  %v2150_v60 = vpack.i.bf16 %v2689_v58, %v2912_v54  ;;  %v2154_v58 = vpack.i.bf16 %v2708_v26, %v2932_v2  ;;  %v2158_v26 = vpack.i.bf16 %v2737_v9, %v2949_v29  ;;  %v2164_v9 = vpack.i.bf16 %v2782_v47, %v2979_v32 }
 0x144   :  { %595 = vmatprep.mubr.f32.mxu0 %v2979_v32  ;;  %v2178_v47 = vpack.i.bf16 %v2887_v18, %v366_v56 }
 0x145   :  { %2151 = vxpose.xlu1.b32.cont [2/16] %v2150_v60, 128 }
 0x147   :  { %596 = vmatmul.mubr.f32.gmra.mrb[48].mxu0 %v2837_v3  ;;  %v374_v3 = vld [vmem:[%s3611_s0 + $0x238] sm:$0xff] }
 0x148   :  { %600 = vmatprep.mubr.f32.mxu0 %v2989_v12 }
 0x149   :  { %2153 = vxpose.xlu1.b32.cont [3/16] %v2152_v41, 128 }
 0x14b   :  { %601 = vmatmul.mubr.f32.gmra.mrb[50].mxu0 %v2852_v11  ;;  %v2162_v11 = vpack.i.bf16 %v2767_v33, %v2969_v39  ;;  %v2174_v33 = vpack.i.bf16 %v2857_v20, %v362_v37 }
 0x14c   :  { %605 = vmatprep.mubr.f32.mxu0 %v356_v48 }
 0x14d   :  { %2155 = vxpose.xlu1.b32.cont [4/16] %v2154_v58, 128 }
 0x14f   :  { %606 = vmatmul.mubr.f32.gmra.mrb[52].mxu0 %v2867_v46  ;;  %v2172_v46 = vpack.i.bf16 %v2842_v6, %v360_v52 }
 0x150   :  { %610 = vmatprep.mubr.f32.mxu0 %v358_v51 }
 0x151   :  { %2157 = vxpose.xlu1.b32.cont [5/16] %v2156_v62, 128 }
 0x153   :  { %611 = vmatmul.mubr.f32.gmra.mrb[54].mxu0 %v2882_v5 }
 0x154   :  { %615 = vmatprep.mubr.f32.mxu0 %v360_v52 }
 0x155   :  { %2159 = vxpose.xlu1.b32.cont [6/16] %v2158_v26, 128 }
 0x157   :  { %616 = vmatmul.mubr.f32.gmra.mrb[56].mxu0 %v2897_v49 }
 0x158   :  { %620 = vmatprep.mubr.f32.mxu0 %v362_v37 }
 0x159   :  { %2161 = vxpose.xlu1.b32.cont [7/16] %v2160_v27, 128 }
 0x15b   :  { %621 = vmatmul.mubr.f32.gmra.mrb[58].mxu0 %v361_v25 }
 0x15c   :  { %625 = vmatprep.mubr.f32.mxu0 %v364_v55 }
 0x15d   :  { %2163 = vxpose.xlu1.b32.cont [8/16] %v2162_v11, 128 }
 0x15f   :  { %626 = vmatmul.mubr.f32.gmra.mrb[60].mxu0 %v363_v22 }
 0x160   :  { %630 = vmatprep.mubr.f32.mxu0 %v366_v56 }
 0x161   :  { %2165 = vxpose.xlu1.b32.cont [9/16] %v2164_v9, 128 }
 0x163   :  { %631 = vmatmul.mubr.f32.gmra.mrb[62].mxu0 %v365_v23 }
 0x164   :  { %635 = vmatprep.mubr.f32.mxu0 %v368_v16 }
 0x165   :  { %2167 = vxpose.xlu1.b32.cont [10/16] %v2166_v21, 128 }
 0x167   :  { %636 = vmatmul.mubr.f32.gmra.mrb[64].mxu0 %v367_v28 }
 0x168   :  { %640 = vmatprep.mubr.f32.mxu0 %v370_v40 }
 0x169   :  { %2169 = vxpose.xlu1.b32.cont [11/16] %v2168_v45, 128 }
 0x16b   :  { %641 = vmatmul.mubr.f32.gmra.mrb[66].mxu0 %v369_v31 }
 0x16c   :  { %645 = vmatprep.mubr.f32.mxu0 %v372_v4 }
 0x16d   :  { %2171 = vxpose.xlu1.b32.cont [12/16] %v2170_v38, 128  ;;  %v3062_v36 = vpop.trf.xlu0 }
 0x16e   :  { %v2069_v59 = vunpack.i.l.bf16 %v3062_v36 }
 0x16f   :  { %646 = vmatmul.mubr.f32.gmra.mrb[68].mxu0 %v371_v35 }
 0x170   :  { %650 = vmatprep.mubr.f32.mxu0 %v374_v3 }
 0x171   :  { %2173 = vxpose.xlu1.b32.cont [13/16] %v2172_v46, 128  ;;  %v3065_v63 = vpop.trf.xlu0 }
 0x173   :  { %651 = vmatmul.mubr.f32.gmra.mrb[70].mxu0 %v373_v43 }
 0x174   :  { %655 = vmatprep.mubr.f32.mxu0 %v376_v7 }
 0x175   :  { %2175 = vxpose.xlu1.b32.cont [14/16] %v2174_v33, 128  ;;  %v3067_v6 = vpop.trf.xlu0 }
 0x177   :  { %656 = vmatmul.mubr.f32.gmra.mrb[72].mxu0 %v375_v44 }
 0x178   :  { %660 = vmatprep.mubr.f32.mxu0 %v378_v10 }
 0x179   :  { %2177 = vxpose.xlu1.b32.cont [15/16] %v2176_v15, 128  ;;  %v3069_v20 = vpop.trf.xlu0 }
 0x17b   :  { %661 = vmatmul.mubr.f32.gmra.mrb[74].mxu0 %v377_v13 }
 0x17c   :  { %1051 = vmatprep.mubr.f32.mxu0 %v2069_v59 }
 0x17d   :  { %2179 = vxpose.xlu1.b32.end [16/16] %v2178_v47, 128  ;;  %v3071_v14 = vpop.trf.xlu0 }
 0x181   :  { %858 = vxpose.xlu1.b32.start [1/6] (short) %v368_v16, 128  ;;  %v3073_v1 = vpop.trf.xlu0 }
 0x182   :  { %v2094_v5 = vunpack.i.l.bf16 %v3073_v1 }
 0x184   :  { %1076 = vmatprep.mubr.f32.mxu1 %v2094_v5 }
 0x185   :  { %859 = vxpose.xlu1.b32.cont [2/6] (short) %v370_v40, 128  ;;  %v3076_v50 = vpop.trf.xlu0 }
 0x189   :  { %860 = vxpose.xlu1.b32.cont [3/6] (short) %v372_v4, 128  ;;  %v3078_v25 = vpop.trf.xlu0 }
 0x18d   :  { %861 = vxpose.xlu1.b32.cont [4/6] (short) %v374_v3, 128  ;;  %v3082_v22 = vpop.trf.xlu0 }
 0x191   :  { %862 = vxpose.xlu1.b32.cont [5/6] (short) %v376_v7, 128  ;;  %v3084_v2 = vpop.trf.xlu0 }
 0x195   :  { %863 = vxpose.xlu1.b32.end [6/6] (short) %v378_v10, 128  ;;  %v3088_v28 = vpop.trf.xlu0 }
 0x199   :  { %v3090_v35 = vpop.trf.xlu0 }
 0x19d   :  { %v3094_v32 = vpop.trf.xlu0 }
 0x1a1   :  { %v3096_v48 = vpop.trf.xlu0 }
 0x1a5   :  { %v3100_v37 = vpop.trf.xlu0 }
 0x1a9   :  { %v3102_v17 = vpop.trf.xlu0 }
 0x1ba   :  { %v477_v18 = vpop.f32.mrb[0].mxu0 }
 0x1bb   :  { %v479_v19 = vpop.f32.mrb[1].mxu0 }
 0x1be   :  { %v482_v49 = vpop.f32.mrb[2].mxu0 }
 0x1bf   :  { %v1943_v0 = vpack.c.bf16 %v482_v49, %v477_v18  ;;  %v484_v24 = vpop.f32.mrb[3].mxu0 }
 0x1c1   :  { %1944 = vmatpush1.bf16.msra.mxu0 %v1943_v0  ;;  %2018 = vmatpush1.bf16.msra.mxu1 %v1943_v0  ;;  %v3106_v41 = vpop.trf.xlu1 }
 0x1c2   :  { %v487_v54 = vpop.f32.mrb[4].mxu0  ;;  %1945 = vmatprep.subr.bf16.mxu0 %v2388_v42  ;;  %2003 = vmatprep.subr.bf16.mxu1 %v2388_v42 }
 0x1c3   :  { %v489_v53 = vpop.f32.mrb[5].mxu0 }
 0x1c5   :  { %v3108_v62 = vpop.trf.xlu1 }
 0x1c6   :  { %v492_v57 = vpop.f32.mrb[6].mxu0 }
 0x1c7   :  { %v1946_v61 = vpack.c.bf16 %v492_v57, %v487_v54  ;;  %v494_v23 = vpop.f32.mrb[7].mxu0 }
 0x1c9   :  { %1947 = vmatpush1.bf16.msra.mxu0 %v1946_v61  ;;  %2019 = vmatpush1.bf16.msra.mxu1 %v1946_v61  ;;  %v3112_v10 = vpop.trf.xlu1 }
 0x1ca   :  { %v497_v30 = vpop.f32.mrb[8].mxu0  ;;  %1948 = vmatprep.subr.bf16.mxu0 %v2388_v42  ;;  %2004 = vmatprep.subr.bf16.mxu1 %v2388_v42 }
 0x1cb   :  { %v499_v8 = vpop.f32.mrb[9].mxu0 }
 0x1cd   :  { %v3114_v21 = vpop.trf.xlu1 }
 0x1ce   :  { %v502_v29 = vpop.f32.mrb[10].mxu0 }
 0x1cf   :  { %v1949_v31 = vpack.c.bf16 %v502_v29, %v497_v30  ;;  %v504_v34 = vpop.f32.mrb[11].mxu0 }
 0x1d1   :  { %1950 = vmatpush1.bf16.msra.mxu0 %v1949_v31  ;;  %2020 = vmatpush1.bf16.msra.mxu1 %v1949_v31  ;;  %v3118_v46 = vpop.trf.xlu1 }
 0x1d2   :  { %v507_v39 = vpop.f32.mrb[12].mxu0  ;;  %1951 = vmatprep.subr.bf16.mxu0 %v2388_v42  ;;  %2005 = vmatprep.subr.bf16.mxu1 %v2388_v42 }
 0x1d3   :  { %v509_v43 = vpop.f32.mrb[13].mxu0 }
 0x1d5   :  { %v3120_v59 = vpop.trf.xlu1 }
 0x1d6   :  { %v512_v44 = vpop.f32.mrb[14].mxu0 }
 0x1d7   :  { %v1952_v12 = vpack.c.bf16 %v512_v44, %v507_v39  ;;  %v514_v13 = vpop.f32.mrb[15].mxu0 }
 0x1d9   :  { %1953 = vmatpush1.bf16.msra.mxu0 %v1952_v12  ;;  %2021 = vmatpush1.bf16.msra.mxu1 %v1952_v12  ;;  %v3124_v19 = vpop.trf.xlu1 }
 0x1da   :  { %v517_v51 = vpop.f32.mrb[16].mxu0  ;;  %1954 = vmatprep.subr.bf16.mxu0 %v2388_v42  ;;  %2006 = vmatprep.subr.bf16.mxu1 %v2388_v42 }
 0x1db   :  { %v519_v52 = vpop.f32.mrb[17].mxu0 }
 0x1dd   :  { %v3126_v54 = vpop.trf.xlu1 }
 0x1de   :  { %v522_v55 = vpop.f32.mrb[18].mxu0 }
 0x1df   :  { %v1955_v56 = vpack.c.bf16 %v522_v55, %v517_v51  ;;  %v524_v16 = vpop.f32.mrb[19].mxu0 }
 0x1e1   :  { %1956 = vmatpush1.bf16.msra.mxu0 %v1955_v56  ;;  %2022 = vmatpush1.bf16.msra.mxu1 %v1955_v56  ;;  %v3130_v61 = vpop.trf.xlu1 }
 0x1e2   :  { %v527_v60 = vpop.f32.mrb[20].mxu0  ;;  %1957 = vmatprep.subr.bf16.mxu0 %v2388_v42  ;;  %2007 = vmatprep.subr.bf16.mxu1 %v2388_v42 }
 0x1e3   :  { %v529_v40 = vpop.f32.mrb[21].mxu0 }
 0x1e5   :  { %v3132_v29 = vpop.trf.xlu1 }
 0x1e6   :  { %v532_v4 = vpop.f32.mrb[22].mxu0 }
 0x1e7   :  { %v1958_v58 = vpack.c.bf16 %v532_v4, %v527_v60  ;;  %v534_v3 = vpop.f32.mrb[23].mxu0 }
 0x1e9   :  { %1959 = vmatpush1.bf16.msra.mxu0 %v1958_v58  ;;  %2023 = vmatpush1.bf16.msra.mxu1 %v1958_v58  ;;  %v3136_v39 = vpop.trf.xlu1 }
 0x1ea   :  { %v537_v7 = vpop.f32.mrb[24].mxu0  ;;  %1960 = vmatprep.subr.bf16.mxu0 %v2388_v42  ;;  %2008 = vmatprep.subr.bf16.mxu1 %v2388_v42 }
 0x1eb   :  { %v539_v26 = vpop.f32.mrb[25].mxu0 }
 0x1ed   :  { %v3138_v13 = vpop.trf.xlu1 }
 0x1ee   :  { %v542_v27 = vpop.f32.mrb[26].mxu0 }
 0x1ef   :  { %v1961_v11 = vpack.c.bf16 %v542_v27, %v537_v7  ;;  %v544_v9 = vpop.f32.mrb[27].mxu0 }
 0x1f1   :  { %1962 = vmatpush1.bf16.msra.mxu0 %v1961_v11  ;;  %2024 = vmatpush1.bf16.msra.mxu1 %v1961_v11  ;;  %v3142_v55 = vpop.trf.xlu1 }
 0x1f2   :  { %v547_v45 = vpop.f32.mrb[28].mxu0  ;;  %1963 = vmatprep.subr.bf16.mxu0 %v2388_v42  ;;  %2009 = vmatprep.subr.bf16.mxu1 %v2388_v42 }
 0x1f3   :  { %v549_v38 = vpop.f32.mrb[29].mxu0 }
 0x1f5   :  { %v3144_v40 = vpop.trf.xlu1 }
 0x1f6   :  { %v552_v33 = vpop.f32.mrb[30].mxu0 }
 0x1f7   :  { %v1964_v15 = vpack.c.bf16 %v552_v33, %v547_v45  ;;  %v554_v47 = vpop.f32.mrb[31].mxu0 }
 0x1f9   :  { %1965 = vmatpush1.bf16.msra.mxu0 %v1964_v15  ;;  %2025 = vmatpush1.bf16.msra.mxu1 %v1964_v15  ;;  %v3148_v3 = vpop.trf.xlu1 }
 0x1fa   :  { %v557_v5 = vpop.f32.mrb[32].mxu0  ;;  %1966 = vmatprep.subr.bf16.mxu0 %v2388_v42  ;;  %2010 = vmatprep.subr.bf16.mxu1 %v2388_v42 }
 0x1fb   :  { %v559_v18 = vpop.f32.mrb[33].mxu0 }
 0x1fd   :  { %v3150_v11 = vpop.trf.xlu1 }
 0x1fe   :  { %v562_v49 = vpop.f32.mrb[34].mxu0 }
 0x1ff   :  { %v1967_v0 = vpack.c.bf16 %v562_v49, %v557_v5  ;;  %v564_v24 = vpop.f32.mrb[35].mxu0 }
 0x201   :  { %1968 = vmatpush1.bf16.msra.mxu0 %v1967_v0  ;;  %2026 = vmatpush1.bf16.msra.mxu1 %v1967_v0 }
 0x202   :  { %v567_v53 = vpop.f32.mrb[36].mxu0  ;;  %1969 = vmatprep.subr.bf16.mxu0 %v2388_v42  ;;  %2011 = vmatprep.subr.bf16.mxu1 %v2388_v42 }
 0x203   :  { %v569_v57 = vpop.f32.mrb[37].mxu0 }
 0x206   :  { %v572_v23 = vpop.f32.mrb[38].mxu0 }
 0x207   :  { %v1970_v30 = vpack.c.bf16 %v572_v23, %v567_v53  ;;  %v574_v8 = vpop.f32.mrb[39].mxu0 }
 0x208   :  { %v2097_v8 = vunpack.i.h.bf16 %v3073_v1  ;;  %v2104_v1 = vunpack.i.l.bf16 %v3078_v25 }
 0x209   :  { %1971 = vmatpush1.bf16.msra.mxu0 %v1970_v30  ;;  %2027 = vmatpush1.bf16.msra.mxu1 %v1970_v30 }
 0x20a   :  { %v577_v31 = vpop.f32.mrb[40].mxu0  ;;  %1972 = vmatprep.subr.bf16.mxu0 %v2388_v42  ;;  %2012 = vmatprep.subr.bf16.mxu1 %v2388_v42 }
 0x20b   :  { %v579_v34 = vpop.f32.mrb[41].mxu0 }
 0x20c   :  { %v2072_v34 = vunpack.i.h.bf16 %v3062_v36  ;;  %v2107_v36 = vunpack.i.h.bf16 %v3078_v25  ;;  %v2114_v25 = vunpack.i.l.bf16 %v3084_v2 }
 0x20e   :  { %v582_v43 = vpop.f32.mrb[42].mxu0 }
 0x20f   :  { %v1973_v44 = vpack.c.bf16 %v582_v43, %v577_v31  ;;  %v584_v12 = vpop.f32.mrb[43].mxu0  ;;  %v2099_v31 = vunpack.i.l.bf16 %v3076_v50 }
 0x210   :  { %v2074_v12 = vunpack.i.l.bf16 %v3065_v63 }
 0x211   :  { %1974 = vmatpush1.bf16.msra.mxu0 %v1973_v44  ;;  %2028 = vmatpush1.bf16.msra.mxu1 %v1973_v44 }
 0x212   :  { %v587_v51 = vpop.f32.mrb[44].mxu0  ;;  %1975 = vmatprep.subr.bf16.mxu0 %v2388_v42  ;;  %2013 = vmatprep.subr.bf16.mxu1 %v2388_v42 }
 0x213   :  { %v589_v52 = vpop.f32.mrb[45].mxu0 }
 0x214   :  { %v2077_v52 = vunpack.i.h.bf16 %v3065_v63  ;;  %v2084_v63 = vunpack.i.l.bf16 %v3069_v20 }
 0x216   :  { %v592_v56 = vpop.f32.mrb[46].mxu0 }
 0x217   :  { %v1976_v16 = vpack.c.bf16 %v592_v56, %v587_v51  ;;  %v594_v60 = vpop.f32.mrb[47].mxu0 }
 0x218   :  { %v2079_v60 = vunpack.i.l.bf16 %v3067_v6 }
 0x219   :  { %1977 = vmatpush1.bf16.msra.mxu0 %v1976_v16  ;;  %2029 = vmatpush1.bf16.msra.mxu1 %v1976_v16 }
 0x21a   :  { %v597_v4 = vpop.f32.mrb[48].mxu0  ;;  %1978 = vmatprep.subr.bf16.mxu0 %v2388_v42  ;;  %2014 = vmatprep.subr.bf16.mxu1 %v2388_v42 }
 0x21b   :  { %v599_v58 = vpop.f32.mrb[49].mxu0 }
 0x21e   :  { %v602_v7 = vpop.f32.mrb[50].mxu0 }
 0x21f   :  { %v1979_v26 = vpack.c.bf16 %v602_v7, %v597_v4  ;;  %v604_v27 = vpop.f32.mrb[51].mxu0  ;;  %v2109_v4 = vunpack.i.l.bf16 %v3082_v22 }
 0x220   :  { %v2087_v27 = vunpack.i.h.bf16 %v3069_v20  ;;  %v2122_v20 = vunpack.i.h.bf16 %v3088_v28 }
 0x221   :  { %1980 = vmatpush1.bf16.msra.mxu0 %v1979_v26  ;;  %2030 = vmatpush1.bf16.msra.mxu1 %v1979_v26  ;;  %v2112_v26 = vunpack.i.h.bf16 %v3082_v22  ;;  %v2092_v22 = vunpack.i.h.bf16 %v3071_v14 }
 0x222   :  { %v607_v9 = vpop.f32.mrb[52].mxu0  ;;  %1981 = vmatprep.subr.bf16.mxu0 %v2388_v42  ;;  %2015 = vmatprep.subr.bf16.mxu1 %v2388_v42 }
 0x223   :  { %v609_v45 = vpop.f32.mrb[53].mxu0 }
 0x224   :  { %v2089_v45 = vunpack.i.l.bf16 %v3071_v14  ;;  %v2129_v14 = vunpack.i.l.bf16 %v3094_v32 }
 0x226   :  { %v612_v38 = vpop.f32.mrb[54].mxu0 }
 0x227   :  { %v1982_v33 = vpack.c.bf16 %v612_v38, %v607_v9  ;;  %v614_v15 = vpop.f32.mrb[55].mxu0 }
 0x228   :  { %v2119_v15 = vunpack.i.l.bf16 %v3088_v28  ;;  %v2134_v28 = vunpack.i.l.bf16 %v3096_v48 }
 0x229   :  { %1983 = vmatpush1.bf16.msra.mxu0 %v1982_v33  ;;  %2031 = vmatpush1.bf16.msra.mxu1 %v1982_v33 }
 0x22a   :  { %v617_v47 = vpop.f32.mrb[56].mxu0  ;;  %1984 = vmatprep.subr.bf16.mxu0 %v2388_v42  ;;  %2016 = vmatprep.subr.bf16.mxu1 %v2388_v42 }
 0x22b   :  { %v619_v5 = vpop.f32.mrb[57].mxu0 }
 0x22e   :  { %v622_v18 = vpop.f32.mrb[58].mxu0 }
 0x22f   :  { %v1985_v49 = vpack.c.bf16 %v622_v18, %v617_v47  ;;  %v624_v0 = vpop.f32.mrb[59].mxu0  ;;  %v2124_v18 = vunpack.i.l.bf16 %v3090_v35 }
 0x231   :  { %1986 = vmatpush1.bf16.msra.mxu0 %v1985_v49  ;;  %2032 = vmatpush1.bf16.msra.mxu1 %v1985_v49 }
 0x232   :  { %v627_v24 = vpop.f32.mrb[60].mxu0  ;;  %1987 = vmatprep.subr.bf16.mxu0 %v2388_v42  ;;  %2017 = vmatprep.subr.bf16.mxu1 %v2388_v42  ;;  %v2102_v42 = vunpack.i.h.bf16 %v3076_v50  ;;  %v2082_v50 = vunpack.i.h.bf16 %v3067_v6  ;;  %v2117_v6 = vunpack.i.h.bf16 %v3084_v2 }
 0x233   :  { %v629_v53 = vpop.f32.mrb[61].mxu0 }
 0x234   :  { %v2132_v53 = vunpack.i.h.bf16 %v3094_v32  ;;  %v2181_v32 = vunpack.i.l.bf16 %v3106_v41 }
 0x236   :  { %v632_v57 = vpop.f32.mrb[62].mxu0 }
 0x237   :  { %v1988_v23 = vpack.c.bf16 %v632_v57, %v627_v24  ;;  %v634_v30 = vpop.f32.mrb[63].mxu0  ;;  %v2127_v24 = vunpack.i.h.bf16 %v3090_v35  ;;  %v2137_v57 = vunpack.i.h.bf16 %v3096_v48  ;;  %v2142_v35 = vunpack.i.h.bf16 %v3100_v37 }
 0x238   :  { %v2144_v30 = vunpack.i.l.bf16 %v3102_v17  ;;  %v2186_v48 = vunpack.i.l.bf16 %v3108_v62 }
 0x239   :  { %1989 = vmatpush1.bf16.msra.mxu0 %v1988_v23  ;;  %2033 = vmatpush1.bf16.msra.mxu1 %v1988_v23  ;;  %v2139_v23 = vunpack.i.l.bf16 %v3100_v37  ;;  %v2189_v37 = vunpack.i.h.bf16 %v3108_v62  ;;  %v2204_v62 = vunpack.i.h.bf16 %v3118_v46 }
 0x23a   :  { %v637_v43 = vpop.f32.mrb[64].mxu0 }
 0x23b   :  { %v639_v44 = vpop.f32.mrb[65].mxu0 }
 0x23c   :  { %1052 = vmatmul.mubr.f32.vlgmr.msra.gmra.mrb[76].mxu0 %v2072_v34  ;;  %1077 = vmatmul.mubr.f32.vlgmr.msra.gmra.mrb[0].mxu1 %v2097_v8  ;;  %v2147_v8 = vunpack.i.h.bf16 %v3102_v17  ;;  %v3191_v34 = vpop.trf.xlu0  ;;  %v2194_v17 = vunpack.i.h.bf16 %v3112_v10  ;;  %v2196_v44 = vunpack.i.l.bf16 %v3114_v21 }
 0x23d   :  { %1056 = vmatprep.mubr.f32.mxu0 %v2074_v12  ;;  %1081 = vmatprep.mubr.f32.mxu1 %v2099_v31  ;;  %v2184_v31 = vunpack.i.h.bf16 %v3106_v41  ;;  %v2199_v41 = vunpack.i.h.bf16 %v3114_v21  ;;  %v2214_v21 = vunpack.i.h.bf16 %v3124_v19 }
 0x23e   :  { %v642_v51 = vpop.f32.mrb[66].mxu0 }
 0x23f   :  { %v1990_v56 = vpack.c.bf16 %v642_v51, %v637_v43  ;;  %v644_v16 = vpop.f32.mrb[67].mxu0  ;;  %v2191_v43 = vunpack.i.l.bf16 %v3112_v10  ;;  %v2209_v10 = vunpack.i.h.bf16 %v3120_v59 }
 0x240   :  { %1057 = vmatmul.mubr.f32.gmra.mrb[78].mxu0 %v2077_v52  ;;  %1082 = vmatmul.mubr.f32.gmra.mrb[2].mxu1 %v2102_v42  ;;  %v3197_v12 = vpop.trf.xlu0  ;;  %v2201_v42 = vunpack.i.l.bf16 %v3118_v46  ;;  %v2206_v52 = vunpack.i.l.bf16 %v3120_v59  ;;  %v2216_v16 = vunpack.i.l.bf16 %v3126_v54  ;;  %v2219_v46 = vunpack.i.h.bf16 %v3126_v54 }
 0x241   :  { %1061 = vmatprep.mubr.f32.mxu0 %v2079_v60  ;;  %1991 = vmatprep.subr.bf16.mxu1 %v1990_v56  ;;  %v2224_v59 = vunpack.i.h.bf16 %v3130_v61  ;;  %v2234_v54 = vunpack.i.h.bf16 %v3136_v39 }
 0x242   :  { %1993 = vmatpush3.bf16.msra.mxu1 %v1990_v56  ;;  %1086 = vmatprep.mubr.f32.mxu1 %v2104_v1  ;;  %v647_v58 = vpop.f32.mrb[68].mxu0  ;;  %v2211_v1 = vunpack.i.l.bf16 %v3124_v19  ;;  %v2229_v19 = vunpack.i.h.bf16 %v3132_v29 }
 0x243   :  { %v649_v7 = vpop.f32.mrb[69].mxu0 }
 0x244   :  { %1062 = vmatmul.mubr.f32.gmra.mrb[80].mxu0 %v2082_v50  ;;  %1087 = vmatmul.mubr.f32.gmra.mrb[4].mxu1 %v2107_v36  ;;  %v3201_v51 = vpop.trf.xlu0  ;;  %v2221_v36 = vunpack.i.l.bf16 %v3130_v61 }
 0x245   :  { %1066 = vmatprep.mubr.f32.mxu0 %v2084_v63  ;;  %1091 = vmatprep.mubr.f32.mxu1 %v2109_v4  ;;  %v2226_v4 = vunpack.i.l.bf16 %v3132_v29  ;;  %v2231_v63 = vunpack.i.l.bf16 %v3136_v39  ;;  %v2244_v29 = vunpack.i.h.bf16 %v3142_v55  ;;  %v2249_v39 = vunpack.i.h.bf16 %v3144_v40 }
 0x246   :  { %v652_v9 = vpop.f32.mrb[70].mxu0 }
 0x247   :  { %v1994_v38 = vpack.c.bf16 %v652_v9, %v647_v58  ;;  %v654_v33 = vpop.f32.mrb[71].mxu0  ;;  %v3213_v58 = vpop.trf.xlu1 }
 0x248   :  { %1067 = vmatmul.mubr.f32.gmra.mrb[82].mxu0 %v2087_v27  ;;  %1092 = vmatmul.mubr.f32.gmra.mrb[6].mxu1 %v2112_v26  ;;  %v845_v56 = vpop.trf.xlu0  ;;  %v2236_v26 = vunpack.i.l.bf16 %v3138_v13  ;;  %v2241_v27 = vunpack.i.l.bf16 %v3142_v55  ;;  %v2259_v55 = vunpack.i.h.bf16 %v3150_v11 }
 0x249   :  { %1071 = vmatprep.mubr.f32.mxu0 %v2089_v45  ;;  %1096 = vmatprep.mubr.f32.mxu1 %v2114_v25  ;;  %v2239_v25 = vunpack.i.h.bf16 %v3138_v13  ;;  %v2254_v13 = vunpack.i.h.bf16 %v3148_v3 }
 0x24a   :  { %1995 = vmatprep.subr.bf16.mxu1 %v1994_v38  ;;  %v657_v47 = vpop.f32.mrb[72].mxu0 }
 0x24b   :  { %1997 = vmatpush3.bf16.msra.mxu1 %v1994_v38  ;;  %v659_v5 = vpop.f32.mrb[73].mxu0  ;;  %v875_v61 = vpop.trf.xlu1  ;;  %v2246_v38 = vunpack.i.l.bf16 %v3144_v40 }
 0x24c   :  { %1072 = vmatmul.mubr.f32.gmra.mrb[84].mxu0 %v2092_v22  ;;  %1097 = vmatmul.mubr.f32.gmra.mrb[8].mxu1 %v2117_v6  ;;  %v846_v60 = vpop.trf.xlu0  ;;  %v2251_v6 = vunpack.i.l.bf16 %v3148_v3  ;;  %v2256_v22 = vunpack.i.l.bf16 %v3150_v11 }
 0x24d   :  { %1101 = vmatprep.mubr.f32.mxu1 %v2119_v15 }
 0x24e   :  { %v662_v49 = vpop.f32.mrb[74].mxu0 }
 0x24f   :  { %v1998_v0 = vpack.c.bf16 %v662_v49, %v657_v47  ;;  %v664_v2 = vpop.f32.mrb[75].mxu0  ;;  %v876_v45 = vpop.trf.xlu1 }
 0x250   :  { %1102 = vmatmul.mubr.f32.gmra.mrb[10].mxu1 %v2122_v20  ;;  %v847_v50 = vpop.trf.xlu0 }
 0x251   :  { %1106 = vmatprep.mubr.f32.mxu1 %v2124_v18  ;;  %1999 = vmatprep.subr.bf16.mxu1 %v1998_v0 }
 0x252   :  { %2001 = vmatpush3.bf16.msra.mxu1 %v1998_v0 }
 0x253   :  { %v877_v15 = vpop.trf.xlu1 }
 0x254   :  { %1107 = vmatmul.mubr.f32.gmra.mrb[12].mxu1 %v2127_v24  ;;  %v848_v7 = vpop.trf.xlu0 }
 0x255   :  { %1111 = vmatprep.mubr.f32.mxu1 %v2129_v14 }
 0x257   :  { %v878_v5 = vpop.trf.xlu1 }
 0x258   :  { %1112 = vmatmul.mubr.f32.gmra.mrb[14].mxu1 %v2132_v53  ;;  %v849_v9 = vpop.trf.xlu0 }
 0x259   :  { %1116 = vmatprep.mubr.f32.mxu1 %v2134_v28 }
 0x25b   :  { %v879_v40 = vpop.trf.xlu1 }
 0x25c   :  { %1117 = vmatmul.mubr.f32.gmra.mrb[16].mxu1 %v2137_v57  ;;  %v850_v33 = vpop.trf.xlu0 }
 0x25d   :  { %1121 = vmatprep.mubr.f32.mxu1 %v2139_v23 }
 0x25f   :  { %v880_v18 = vpop.trf.xlu1 }
 0x260   :  { %1122 = vmatmul.mubr.f32.gmra.mrb[18].mxu1 %v2142_v35  ;;  %v851_v47 = vpop.trf.xlu0 }
 0x261   :  { %1126 = vmatprep.mubr.f32.mxu1 %v2144_v30 }
 0x263   :  { %v881_v49 = vpop.trf.xlu1 }
 0x264   :  { %1127 = vmatmul.mubr.f32.gmra.mrb[20].mxu1 %v2147_v8  ;;  %v852_v20 = vpop.trf.xlu0 }
 0x265   :  { %1131 = vmatprep.mubr.f32.mxu1 %v2181_v32 }
 0x267   :  { %v882_v2 = vpop.trf.xlu1 }
 0x268   :  { %1132 = vmatmul.mubr.f32.gmra.mrb[22].mxu1 %v2184_v31  ;;  %v853_v3 = vpop.trf.xlu0 }
 0x269   :  { %1136 = vmatprep.mubr.f32.mxu1 %v2186_v48 }
 0x26b   :  { %v883_v14 = vpop.trf.xlu1 }
 0x26c   :  { %1137 = vmatmul.mubr.f32.gmra.mrb[24].mxu1 %v2189_v37  ;;  %v854_v11 = vpop.trf.xlu0 }
 0x26d   :  { %1141 = vmatprep.mubr.f32.mxu1 %v2191_v43 }
 0x26f   :  { %v884_v28 = vpop.trf.xlu1 }
 0x270   :  { %1142 = vmatmul.mubr.f32.gmra.mrb[26].mxu1 %v2194_v17  ;;  %v855_v0 = vpop.trf.xlu0 }
 0x271   :  { %1146 = vmatprep.mubr.f32.mxu1 %v2196_v44 }
 0x273   :  { %v885_v57 = vpop.trf.xlu1 }
 0x274   :  { %1147 = vmatmul.mubr.f32.gmra.mrb[28].mxu1 %v2199_v41  ;;  %v856_v24 = vpop.trf.xlu0 }
 0x275   :  { %1151 = vmatprep.mubr.f32.mxu1 %v2201_v42 }
 0x277   :  { %v886_v23 = vpop.trf.xlu1 }
 0x278   :  { %1152 = vmatmul.mubr.f32.gmra.mrb[30].mxu1 %v2204_v62  ;;  %v857_v53 = vpop.trf.xlu0 }
 0x279   :  { %1156 = vmatprep.mubr.f32.mxu1 %v2206_v52 }
 0x27b   :  { %v887_v35 = vpop.trf.xlu1 }
 0x27c   :  { %1157 = vmatmul.mubr.f32.gmra.mrb[32].mxu1 %v2209_v10 }
 0x27d   :  { %1161 = vmatprep.mubr.f32.mxu1 %v2211_v1 }
 0x27f   :  { %v888_v30 = vpop.trf.xlu1 }
 0x280   :  { %1162 = vmatmul.mubr.f32.gmra.mrb[34].mxu1 %v2214_v21 }
 0x281   :  { %1166 = vmatprep.mubr.f32.mxu1 %v2216_v16 }
 0x283   :  { %v889_v8 = vpop.trf.xlu1 }
 0x284   :  { %1167 = vmatmul.mubr.f32.gmra.mrb[36].mxu1 %v2219_v46 }
 0x285   :  { %1171 = vmatprep.mubr.f32.mxu1 %v2221_v36 }
 0x288   :  { %1172 = vmatmul.mubr.f32.gmra.mrb[38].mxu1 %v2224_v59 }
 0x289   :  { %1176 = vmatprep.mubr.f32.mxu1 %v2226_v4 }
 0x28c   :  { %1177 = vmatmul.mubr.f32.gmra.mrb[40].mxu1 %v2229_v19 }
 0x28d   :  { %1181 = vmatprep.mubr.f32.mxu1 %v2231_v63 }
 0x290   :  { %1182 = vmatmul.mubr.f32.gmra.mrb[42].mxu1 %v2234_v54 }
 0x291   :  { %1186 = vmatprep.mubr.f32.mxu1 %v2236_v26 }
 0x294   :  { %1187 = vmatmul.mubr.f32.gmra.mrb[44].mxu1 %v2239_v25 }
 0x295   :  { %1191 = vmatprep.mubr.f32.mxu1 %v2241_v27 }
 0x298   :  { %1192 = vmatmul.mubr.f32.gmra.mrb[46].mxu1 %v2244_v29 }
 0x299   :  { %1196 = vmatprep.mubr.f32.mxu1 %v2246_v38 }
 0x29c   :  { %1197 = vmatmul.mubr.f32.gmra.mrb[48].mxu1 %v2249_v39 }
 0x29d   :  { %1201 = vmatprep.mubr.f32.mxu1 %v2251_v6 }
 0x2a0   :  { %1202 = vmatmul.mubr.f32.gmra.mrb[50].mxu1 %v2254_v13 }
 0x2a1   :  { %1206 = vmatprep.mubr.f32.mxu1 %v2256_v22 }
 0x2a4   :  { %1207 = vmatmul.mubr.f32.gmra.mrb[52].mxu1 %v2259_v55 }
 0x2a5   :  { %1846 = vmatprep.mubr.msk.f32.mxu1 %vm890_vm0, %v3191_v34 }
 0x2a8   :  { %1847 = vmatmul.mubr.msk.f32.vlgmr.msra.gmra.mrb[54].mxu1 %vm890_vm0, %v3197_v12 }
 0x2a9   :  { %1849 = vmatprep.mubr.msk.f32.mxu1 %vm890_vm0, %v3201_v51 }
 0x2ac   :  { %1850 = vmatmul.mubr.msk.f32.gmra.mrb[56].mxu1 %vm890_vm0, %v845_v56 }
 0x2ad   :  { %1852 = vmatprep.mubr.msk.f32.mxu1 %vm890_vm0, %v846_v60 }
 0x2b0   :  { %1853 = vmatmul.mubr.msk.f32.gmra.mrb[58].mxu1 %vm890_vm0, %v847_v50 }
 0x2b1   :  { %1855 = vmatprep.mubr.msk.f32.mxu1 %vm890_vm0, %v848_v7 }
 0x2b4   :  { %1856 = vmatmul.mubr.msk.f32.gmra.mrb[60].mxu1 %vm890_vm0, %v849_v9 }
 0x2b5   :  { %1858 = vmatprep.mubr.msk.f32.mxu1 %vm890_vm0, %v850_v33 }
 0x2b8   :  { %1859 = vmatmul.mubr.msk.f32.gmra.mrb[62].mxu1 %vm890_vm0, %v851_v47 }
 0x2b9   :  { %1861 = vmatprep.mubr.msk.f32.mxu1 %vm890_vm0, %v852_v20 }
 0x2bc   :  { %1862 = vmatmul.mubr.msk.f32.gmra.mrb[64].mxu1 %vm890_vm0, %v853_v3 }
 0x2bd   :  { %1864 = vmatprep.mubr.msk.f32.mxu1 %vm890_vm0, %v854_v11 }
 0x2c0   :  { %1865 = vmatmul.mubr.msk.f32.gmra.mrb[66].mxu1 %vm890_vm0, %v855_v0 }
 0x2c1   :  { %1867 = vmatprep.mubr.msk.f32.mxu1 %vm890_vm0, %v856_v24 }
 0x2c4   :  { %1868 = vmatmul.mubr.msk.f32.gmra.mrb[68].mxu1 %vm890_vm0, %v857_v53 }
 0x2c5   :  { %1870 = vmatprep.mubr.msk.f32.mxu1 %vm890_vm0, %v3213_v58 }
 0x2c8   :  { %1871 = vmatmul.mubr.msk.f32.gmra.mrb[70].mxu1 %vm890_vm0, %v875_v61 }
 0x2c9   :  { %1873 = vmatprep.mubr.msk.f32.mxu1 %vm890_vm0, %v876_v45 }
 0x2cc   :  { %1874 = vmatmul.mubr.msk.f32.gmra.mrb[72].mxu1 %vm890_vm0, %v877_v15 }
 0x2cd   :  { %1876 = vmatprep.mubr.msk.f32.mxu1 %vm890_vm0, %v878_v5 }
 0x2d0   :  { %1877 = vmatmul.mubr.msk.f32.gmra.mrb[74].mxu1 %vm890_vm0, %v879_v40 }
 0x2d1   :  { %1879 = vmatprep.mubr.msk.f32.mxu1 %vm890_vm0, %v880_v18 }
 0x2d4   :  { %1880 = vmatmul.mubr.msk.f32.gmra.mrb[76].mxu1 %vm890_vm0, %v881_v49 }
 0x2d5   :  { %1882 = vmatprep.mubr.msk.f32.mxu1 %vm890_vm0, %v882_v2 }
 0x2d8   :  { %1883 = vmatmul.mubr.msk.f32.gmra.mrb[78].mxu1 %vm890_vm0, %v883_v14 }
 0x2d9   :  { %1885 = vmatprep.mubr.msk.f32.mxu1 %vm890_vm0, %v884_v28 }
 0x2dc   :  { %1886 = vmatmul.mubr.msk.f32.gmra.mrb[80].mxu1 %vm890_vm0, %v885_v57 }
 0x2dd   :  { %1888 = vmatprep.mubr.msk.f32.mxu1 %vm890_vm0, %v886_v23 }
 0x2e0   :  { %1889 = vmatmul.mubr.msk.f32.gmra.mrb[82].mxu1 %vm890_vm0, %v887_v35 }
 0x2e1   :  { %1891 = vmatprep.mubr.msk.f32.mxu1 %vm890_vm0, %v888_v30 }
 0x2e4   :  { %1892 = vmatmul.mubr.msk.f32.gmra.mrb[84].mxu1 %vm890_vm0, %v889_v8 }
 0x30f   :  { %v3264_v32 = vpop.f32.mrb[76].mxu0  ;;  %v3266_v31 = vpop.f32.mrb[0].mxu1 }
 0x310   :  { %v1055_v48 = vpop.f32.mrb[77].mxu0  ;;  %v1080_v34 = vpop.f32.mrb[1].mxu1 }
 0x313   :  { %v1058_v37 = vpop.f32.mrb[78].mxu0  ;;  %v3268_v43 = vpop.f32.mrb[2].mxu1 }
 0x314   :  { %v1060_v17 = vpop.f32.mrb[79].mxu0  ;;  %v1085_v44 = vpop.f32.mrb[3].mxu1 }
 0x317   :  { %v3270_v12 = vpop.f32.mrb[80].mxu0  ;;  %v3272_v41 = vpop.f32.mrb[4].mxu1 }
 0x318   :  { %v1065_v42 = vpop.f32.mrb[81].mxu0  ;;  %v1090_v51 = vpop.f32.mrb[5].mxu1 }
 0x31b   :  { %v1068_v62 = vpop.f32.mrb[82].mxu0  ;;  %v3274_v52 = vpop.f32.mrb[6].mxu1 }
 0x31c   :  { %v1070_v10 = vpop.f32.mrb[83].mxu0  ;;  %v1095_v1 = vpop.f32.mrb[7].mxu1 }
 0x31f   :  { %v3276_v56 = vpop.f32.mrb[84].mxu0  ;;  %v3278_v21 = vpop.f32.mrb[8].mxu1 }
 0x320   :  { %v1075_v16 = vpop.f32.mrb[85].mxu0  ;;  %v1100_v60 = vpop.f32.mrb[9].mxu1 }
 0x323   :  { %v3280_v46 = vpop.f32.mrb[10].mxu1 }
 0x324   :  { %v1105_v36 = vpop.f32.mrb[11].mxu1 }
 0x327   :  { %v3282_v59 = vpop.f32.mrb[12].mxu1 }
 0x328   :  { %v1110_v4 = vpop.f32.mrb[13].mxu1 }
 0x32b   :  { %v3284_v50 = vpop.f32.mrb[14].mxu1 }
 0x32c   :  { %v1115_v58 = vpop.f32.mrb[15].mxu1 }
 0x32f   :  { %v3286_v19 = vpop.f32.mrb[16].mxu1 }
 0x330   :  { %v1120_v63 = vpop.f32.mrb[17].mxu1 }
 0x333   :  { %v3288_v7 = vpop.f32.mrb[18].mxu1 }
 0x334   :  { %v1125_v54 = vpop.f32.mrb[19].mxu1 }
 0x337   :  { %v3290_v26 = vpop.f32.mrb[20].mxu1 }
 0x338   :  { %v1130_v61 = vpop.f32.mrb[21].mxu1 }
 0x33b   :  { %v3292_v25 = vpop.f32.mrb[22].mxu1 }
 0x33c   :  { %v1135_v27 = vpop.f32.mrb[23].mxu1 }
 0x33f   :  { %v3294_v9 = vpop.f32.mrb[24].mxu1 }
 0x340   :  { %v1140_v45 = vpop.f32.mrb[25].mxu1 }
 0x343   :  { %v3296_v29 = vpop.f32.mrb[26].mxu1 }
 0x344   :  { %v1145_v38 = vpop.f32.mrb[27].mxu1 }
 0x347   :  { %v3298_v33 = vpop.f32.mrb[28].mxu1 }
 0x348   :  { %v1150_v39 = vpop.f32.mrb[29].mxu1 }
 0x34b   :  { %v3300_v6 = vpop.f32.mrb[30].mxu1 }
 0x34c   :  { %v1155_v15 = vpop.f32.mrb[31].mxu1 }
 0x34f   :  { %v3302_v13 = vpop.f32.mrb[32].mxu1 }
 0x350   :  { %v1160_v22 = vpop.f32.mrb[33].mxu1 }
 0x353   :  { %v3304_v47 = vpop.f32.mrb[34].mxu1 }
 0x354   :  { %v1165_v5 = vpop.f32.mrb[35].mxu1 }
 0x357   :  { %v3306_v55 = vpop.f32.mrb[36].mxu1 }
 0x358   :  { %v1170_v20 = vpop.f32.mrb[37].mxu1 }
 0x35b   :  { %v3308_v40 = vpop.f32.mrb[38].mxu1 }
 0x35c   :  { %v1175_v3 = vpop.f32.mrb[39].mxu1 }
 0x35f   :  { %v3310_v18 = vpop.f32.mrb[40].mxu1 }
 0x360   :  { %v1180_v11 = vpop.f32.mrb[41].mxu1 }
 0x363   :  { %v3312_v49 = vpop.f32.mrb[42].mxu1 }
 0x364   :  { %v1185_v0 = vpop.f32.mrb[43].mxu1 }
 0x367   :  { %v3314_v2 = vpop.f32.mrb[44].mxu1 }
 0x368   :  { %v1190_v24 = vpop.f32.mrb[45].mxu1 }
 0x36b   :  { %v3316_v14 = vpop.f32.mrb[46].mxu1 }
 0x36c   :  { %v1195_v53 = vpop.f32.mrb[47].mxu1 }
 0x36f   :  { %v3318_v28 = vpop.f32.mrb[48].mxu1 }
 0x370   :  { %v1200_v57 = vpop.f32.mrb[49].mxu1 }
 0x373   :  { %v3320_v23 = vpop.f32.mrb[50].mxu1 }
 0x374   :  { %v1205_v35 = vpop.f32.mrb[51].mxu1 }
 0x377   :  { %v3322_v30 = vpop.f32.mrb[52].mxu1 }
 0x378   :  { %v1210_v8 = vpop.f32.mrb[53].mxu1 }
 0x37b   :  { %v1848_v48 = vpop.f32.mrb[54].mxu1 }
 0x37c   :  { %v3324_v34 = vadd.f32 %v1848_v48, %v1058_v37  ;;  %v1278_v17 = vpop.f32.mrb[55].mxu1 }
 0x37d   :  { %v3327_v44 = vadd.f32 %v1278_v17, %v3264_v32 }
 0x37e   :  { %v1537_v42 = vmul.f32 %v3324_v34, %v3324_v34 }
 0x37f   :  { %v1851_v51 = vpop.f32.mrb[56].mxu1  ;;  %v1536_v10 = vmul.f32 %v3327_v44, %v3327_v44 }
 0x380   :  { %v3333_v1 = vadd.f32 %v1851_v51, %v1068_v62  ;;  %v1288_v16 = vpop.f32.mrb[57].mxu1  ;;  %1570 = vadd.xlane.f32.xlu1 %v1537_v42 }
 0x381   :  { %v3336_v60 = vadd.f32 %v1288_v16, %v3270_v12  ;;  %1568 = vadd.xlane.f32.xlu0 %v1536_v10 }
 0x382   :  { %v1539_v37 = vmul.f32 %v3333_v1, %v3333_v1 }
 0x383   :  { %v1538_v32 = vmul.f32 %v3336_v60, %v3336_v60  ;;  %v1854_v36 = vpop.f32.mrb[58].mxu1 }
 0x384   :  { %v3343_v4 = vadd.f32 %v1854_v36, %v3266_v31  ;;  %v1298_v58 = vpop.f32.mrb[59].mxu1  ;;  %1574 = vadd.xlane.f32.xlu1 %v1539_v37 }
 0x385   :  { %v3346_v62 = vadd.f32 %v1298_v58, %v3276_v56  ;;  %1572 = vadd.xlane.f32.xlu0 %v1538_v32 }
 0x386   :  { %v1541_v12 = vmul.f32 %v3343_v4, %v3343_v4 }
 0x387   :  { %v1540_v63 = vmul.f32 %v3346_v62, %v3346_v62  ;;  %v1857_v54 = vpop.f32.mrb[60].mxu1 }
 0x388   :  { %v3353_v61 = vadd.f32 %v1857_v54, %v3272_v41  ;;  %v1308_v27 = vpop.f32.mrb[61].mxu1  ;;  %1578 = vadd.xlane.f32.xlu1 %v1541_v12 }
 0x389   :  { %v3356_v31 = vadd.f32 %v1308_v27, %v3268_v43  ;;  %1576 = vadd.xlane.f32.xlu0 %v1540_v63 }
 0x38a   :  { %v1543_v56 = vmul.f32 %v3353_v61, %v3353_v61 }
 0x38b   :  { %v1542_v45 = vmul.f32 %v3356_v31, %v3356_v31  ;;  %v1860_v38 = vpop.f32.mrb[62].mxu1 }
 0x38c   :  { %v3363_v39 = vadd.f32 %v1860_v38, %v3278_v21  ;;  %v1318_v15 = vpop.f32.mrb[63].mxu1  ;;  %1582 = vadd.xlane.f32.xlu1 %v1543_v56 }
 0x38d   :  { %v3366_v41 = vadd.f32 %v1318_v15, %v3274_v52  ;;  %1580 = vadd.xlane.f32.xlu0 %v1542_v45 }
 0x38e   :  { %v1545_v43 = vmul.f32 %v3363_v39, %v3363_v39 }
 0x38f   :  { %v1544_v22 = vmul.f32 %v3366_v41, %v3366_v41  ;;  %v1863_v5 = vpop.f32.mrb[64].mxu1 }
 0x390   :  { %v3373_v20 = vadd.f32 %v1863_v5, %v3282_v59  ;;  %v1328_v3 = vpop.f32.mrb[65].mxu1  ;;  %1586 = vadd.xlane.f32.xlu1 %v1545_v43 }
 0x391   :  { %v3376_v21 = vadd.f32 %v1328_v3, %v3280_v46  ;;  %1584 = vadd.xlane.f32.xlu0 %v1544_v22 }
 0x392   :  { %v1547_v52 = vmul.f32 %v3373_v20, %v3373_v20 }
 0x393   :  { %v1546_v11 = vmul.f32 %v3376_v21, %v3376_v21  ;;  %v1866_v0 = vpop.f32.mrb[66].mxu1 }
 0x394   :  { %v3383_v24 = vadd.f32 %v1866_v0, %v3286_v19  ;;  %v1338_v53 = vpop.f32.mrb[67].mxu1  ;;  %1590 = vadd.xlane.f32.xlu1 %v1547_v52 }
 0x395   :  { %v3386_v59 = vadd.f32 %v1338_v53, %v3284_v50  ;;  %1588 = vadd.xlane.f32.xlu0 %v1546_v11 }
 0x396   :  { %v1549_v46 = vmul.f32 %v3383_v24, %v3383_v24 }
 0x397   :  { %v1548_v57 = vmul.f32 %v3386_v59, %v3386_v59  ;;  %v1869_v35 = vpop.f32.mrb[68].mxu1 }
 0x398   :  { %v3393_v8 = vadd.f32 %v1869_v35, %v3290_v26  ;;  %v1348_v48 = vpop.f32.mrb[69].mxu1  ;;  %1594 = vadd.xlane.f32.xlu1 %v1549_v46 }
 0x399   :  { %v3396_v19 = vadd.f32 %v1348_v48, %v3288_v7  ;;  %1592 = vadd.xlane.f32.xlu0 %v1548_v57 }
 0x39a   :  { %v1551_v50 = vmul.f32 %v3393_v8, %v3393_v8 }
 0x39b   :  { %v1550_v17 = vmul.f32 %v3396_v19, %v3396_v19  ;;  %v1872_v42 = vpop.f32.mrb[70].mxu1 }
 0x39c   :  { %v3403_v51 = vadd.f32 %v1872_v42, %v3294_v9  ;;  %v1358_v10 = vpop.f32.mrb[71].mxu1  ;;  %1598 = vadd.xlane.f32.xlu1 %v1551_v50 }
 0x39d   :  { %v3406_v26 = vadd.f32 %v1358_v10, %v3292_v25  ;;  %1596 = vadd.xlane.f32.xlu0 %v1550_v17 }
 0x39e   :  { %v1553_v7 = vmul.f32 %v3403_v51, %v3403_v51 }
 0x39f   :  { %v1552_v16 = vmul.f32 %v3406_v26, %v3406_v26  ;;  %v1875_v37 = vpop.f32.mrb[72].mxu1 }
 0x3a0   :  { %v3413_v32 = vadd.f32 %v1875_v37, %v3298_v33  ;;  %v1368_v36 = vpop.f32.mrb[73].mxu1  ;;  %1602 = vadd.xlane.f32.xlu1 %v1553_v7 }
 0x3a1   :  { %v3416_v9 = vadd.f32 %v1368_v36, %v3296_v29  ;;  %1600 = vadd.xlane.f32.xlu0 %v1552_v16 }
 0x3a2   :  { %v1555_v25 = vmul.f32 %v3413_v32, %v3413_v32 }
 0x3a3   :  { %v1554_v58 = vmul.f32 %v3416_v9, %v3416_v9  ;;  %v1878_v12 = vpop.f32.mrb[74].mxu1 }
 0x3a4   :  { %v3423_v63 = vadd.f32 %v1878_v12, %v3302_v13  ;;  %v1378_v54 = vpop.f32.mrb[75].mxu1  ;;  %1606 = vadd.xlane.f32.xlu1 %v1555_v25 }
 0x3a5   :  { %v3426_v33 = vadd.f32 %v1378_v54, %v3300_v6  ;;  %1604 = vadd.xlane.f32.xlu0 %v1554_v58 }
 0x3a6   :  { %v1557_v29 = vmul.f32 %v3423_v63, %v3423_v63 }
 0x3a7   :  { %v1556_v27 = vmul.f32 %v3426_v33, %v3426_v33  ;;  %v1881_v56 = vpop.f32.mrb[76].mxu1 }
 0x3a8   :  { %v3433_v45 = vadd.f32 %v1881_v56, %v3306_v55  ;;  %v1388_v38 = vpop.f32.mrb[77].mxu1  ;;  %1610 = vadd.xlane.f32.xlu1 %v1557_v29 }
 0x3a9   :  { %v3436_v13 = vadd.f32 %v1388_v38, %v3304_v47  ;;  %1608 = vadd.xlane.f32.xlu0 %v1556_v27 }
 0x3aa   :  { %v1559_v6 = vmul.f32 %v3433_v45, %v3433_v45 }
 0x3ab   :  { %v1558_v15 = vmul.f32 %v3436_v13, %v3436_v13  ;;  %v1884_v43 = vpop.f32.mrb[78].mxu1 }
 0x3ac   :  { %v3443_v22 = vadd.f32 %v1884_v43, %v3310_v18  ;;  %v1398_v5 = vpop.f32.mrb[79].mxu1  ;;  %1614 = vadd.xlane.f32.xlu1 %v1559_v6 }
 0x3ad   :  { %v3446_v55 = vadd.f32 %v1398_v5, %v3308_v40  ;;  %1612 = vadd.xlane.f32.xlu0 %v1558_v15 }
 0x3ae   :  { %v1561_v47 = vmul.f32 %v3443_v22, %v3443_v22 }
 0x3af   :  { %v1560_v3 = vmul.f32 %v3446_v55, %v3446_v55  ;;  %v1887_v52 = vpop.f32.mrb[80].mxu1 }
 0x3b0   :  { %v3453_v11 = vadd.f32 %v1887_v52, %v3314_v2  ;;  %v1408_v0 = vpop.f32.mrb[81].mxu1  ;;  %1618 = vadd.xlane.f32.xlu1 %v1561_v47 }
 0x3b1   :  { %v3456_v18 = vadd.f32 %v1408_v0, %v3312_v49  ;;  %1616 = vadd.xlane.f32.xlu0 %v1560_v3 }
 0x3b2   :  { %v1563_v40 = vmul.f32 %v3453_v11, %v3453_v11 }
 0x3b3   :  { %v1562_v53 = vmul.f32 %v3456_v18, %v3456_v18  ;;  %v1890_v46 = vpop.f32.mrb[82].mxu1 }
 0x3b4   :  { %v3463_v57 = vadd.f32 %v1890_v46, %v3318_v28  ;;  %v1418_v35 = vpop.f32.mrb[83].mxu1  ;;  %1622 = vadd.xlane.f32.xlu1 %v1563_v40 }
 0x3b5   :  { %v3466_v2 = vadd.f32 %v1418_v35, %v3316_v14  ;;  %1620 = vadd.xlane.f32.xlu0 %v1562_v53 }
 0x3b6   :  { %v1565_v49 = vmul.f32 %v3463_v57, %v3463_v57 }
 0x3b7   :  { %v1564_v48 = vmul.f32 %v3466_v2, %v3466_v2  ;;  %v1893_v50 = vpop.f32.mrb[84].mxu1 }
 0x3b8   :  { %v3473_v17 = vadd.f32 %v1893_v50, %v3322_v30  ;;  %v1428_v42 = vpop.f32.mrb[85].mxu1  ;;  %1626 = vadd.xlane.f32.xlu1 %v1565_v49 }
 0x3b9   :  { %v3476_v28 = vadd.f32 %v1428_v42, %v3320_v23  ;;  %1624 = vadd.xlane.f32.xlu0 %v1564_v48 }
 0x3ba   :  { %v1567_v14 = vmul.f32 %v3473_v17, %v3473_v17 }
 0x3bb   :  { %v1566_v10 = vmul.f32 %v3476_v28, %v3476_v28 }
 0x3bc   :  { %1630 = vadd.xlane.f32.xlu1 %v1567_v14 }
 0x3bd   :  { %1628 = vadd.xlane.f32.xlu0 %v1566_v10 }
 0x40d   :  { %v1571_v7 = vpop.xlane.xlu1 %1570 }
 0x40e   :  { %v1633_v16 = vmax.f32 %v1571_v7, 1e-24  ;;  %v1569_v37 = vpop.xlane.xlu0 %1568 }
 0x40f   :  { %v1632_v36 = vmax.f32 %v1569_v37, 1e-24 }
 0x410   :  { %2324 = vrsqrt.f32 %v1633_v16 }
 0x411   :  { %2326 = vrsqrt.f32 %v1632_v36  ;;  %v1575_v30 = vpop.xlane.xlu1 %1574 }
 0x412   :  { %v1635_v25 = vmax.f32 %v1575_v30, 1e-24  ;;  %v1573_v58 = vpop.xlane.xlu0 %1572 }
 0x413   :  { %v1634_v23 = vmax.f32 %v1573_v58, 1e-24 }
 0x414   :  { %2328 = vrsqrt.f32 %v1635_v25 }
 0x415   :  { %2330 = vrsqrt.f32 %v1634_v23  ;;  %v1579_v12 = vpop.xlane.xlu1 %1578 }
 0x416   :  { %v1637_v54 = vmax.f32 %v1579_v12, 1e-24  ;;  %v1577_v29 = vpop.xlane.xlu0 %1576 }
 0x417   :  { %v1636_v27 = vmax.f32 %v1577_v29, 1e-24 }
 0x418   :  { %2332 = vrsqrt.f32 %v1637_v54 }
 0x419   :  { %2334 = vrsqrt.f32 %v1636_v27  ;;  %v1583_v56 = vpop.xlane.xlu1 %1582 }
 0x41a   :  { %v2325_v38 = vpop.eup %2324  ;;  %v1639_v6 = vmax.f32 %v1583_v56, 1e-24  ;;  %v1581_v15 = vpop.xlane.xlu0 %1580 }
 0x41b   :  { %v2327_v43 = vpop.eup %2326  ;;  %v1697_v5 = vmul.f32 %v2325_v38, %v3324_v34  ;;  %v1638_v47 = vmax.f32 %v1581_v15, 1e-24 }
 0x41c   :  { %v1696_v3 = vmul.f32 %v2327_v43, %v3327_v44  ;;  %2336 = vrsqrt.f32 %v1639_v6 }
 0x41d   :  { %1729 = vst [vmem:[%s3612_s2 + $0x8] sm:$0xff] %v1697_v5  ;;  %2338 = vrsqrt.f32 %v1638_v47  ;;  %v1587_v52 = vpop.xlane.xlu1 %1586 }
 0x41e   :  { %v2329_v0 = vpop.eup %2328  ;;  %1728 = vst [vmem:[%s3612_s2] sm:$0xff] %v1696_v3  ;;  %v1641_v40 = vmax.f32 %v1587_v52, 1e-24  ;;  %v1585_v53 = vpop.xlane.xlu0 %1584 }
 0x41f   :  { %v2331_v46 = vpop.eup %2330  ;;  %v1699_v34 = vmul.f32 %v2329_v0, %v3333_v1  ;;  %v1640_v35 = vmax.f32 %v1585_v53, 1e-24 }
 0x420   :  { %v1698_v44 = vmul.f32 %v2331_v46, %v3336_v60  ;;  %2340 = vrsqrt.f32 %v1641_v40 }
 0x421   :  { %1731 = vst [vmem:[%s3612_s2 + $0x18] sm:$0xff] %v1699_v34  ;;  %2342 = vrsqrt.f32 %v1640_v35  ;;  %v1591_v49 = vpop.xlane.xlu1 %1590 }
 0x422   :  { %v2333_v48 = vpop.eup %2332  ;;  %1730 = vst [vmem:[%s3612_s2 + $0x10] sm:$0xff] %v1698_v44  ;;  %v1643_v50 = vmax.f32 %v1591_v49, 1e-24  ;;  %v1589_v42 = vpop.xlane.xlu0 %1588 }
 0x423   :  { %v2335_v14 = vpop.eup %2334  ;;  %v1701_v1 = vmul.f32 %v2333_v48, %v3343_v4  ;;  %v1642_v10 = vmax.f32 %v1589_v42, 1e-24 }
 0x424   :  { %v1700_v60 = vmul.f32 %v2335_v14, %v3346_v62  ;;  %2344 = vrsqrt.f32 %v1643_v50 }
 0x425   :  { %1733 = vst [vmem:[%s3612_s2 + $0x28] sm:$0xff] %v1701_v1  ;;  %2346 = vrsqrt.f32 %v1642_v10  ;;  %v1595_v7 = vpop.xlane.xlu1 %1594 }
 0x426   :  { %v2337_v16 = vpop.eup %2336  ;;  %1732 = vst [vmem:[%s3612_s2 + $0x20] sm:$0xff] %v1700_v60  ;;  %v1645_v37 = vmax.f32 %v1595_v7, 1e-24  ;;  %v1593_v36 = vpop.xlane.xlu0 %1592 }
 0x427   :  { %v2339_v30 = vpop.eup %2338  ;;  %v1703_v4 = vmul.f32 %v2337_v16, %v3353_v61  ;;  %v1644_v25 = vmax.f32 %v1593_v36, 1e-24 }
 0x428   :  { %v1702_v62 = vmul.f32 %v2339_v30, %v3356_v31  ;;  %2348 = vrsqrt.f32 %v1645_v37 }
 0x429   :  { %1735 = vst [vmem:[%s3612_s2 + $0x38] sm:$0xff] %v1703_v4  ;;  %2350 = vrsqrt.f32 %v1644_v25  ;;  %v1599_v58 = vpop.xlane.xlu1 %1598 }
 0x42a   :  { %v2341_v23 = vpop.eup %2340  ;;  %1734 = vst [vmem:[%s3612_s2 + $0x30] sm:$0xff] %v1702_v62  ;;  %v1647_v12 = vmax.f32 %v1599_v58, 1e-24  ;;  %v1597_v54 = vpop.xlane.xlu0 %1596 }
 0x42b   :  { %v2343_v29 = vpop.eup %2342  ;;  %v1705_v61 = vmul.f32 %v2341_v23, %v3363_v39  ;;  %v1646_v27 = vmax.f32 %v1597_v54, 1e-24 }
 0x42c   :  { %v1704_v31 = vmul.f32 %v2343_v29, %v3366_v41  ;;  %2352 = vrsqrt.f32 %v1647_v12 }
 0x42d   :  { %1737 = vst [vmem:[%s3612_s2 + $0x48] sm:$0xff] %v1705_v61  ;;  %2354 = vrsqrt.f32 %v1646_v27  ;;  %v1603_v56 = vpop.xlane.xlu1 %1602 }
 0x42e   :  { %v2345_v38 = vpop.eup %2344  ;;  %1736 = vst [vmem:[%s3612_s2 + $0x40] sm:$0xff] %v1704_v31  ;;  %v1649_v6 = vmax.f32 %v1603_v56, 1e-24  ;;  %v1601_v15 = vpop.xlane.xlu0 %1600 }
 0x42f   :  { %v2347_v43 = vpop.eup %2346  ;;  %v1707_v39 = vmul.f32 %v2345_v38, %v3373_v20  ;;  %v1648_v5 = vmax.f32 %v1601_v15, 1e-24 }
 0x430   :  { %v1706_v41 = vmul.f32 %v2347_v43, %v3376_v21  ;;  %2356 = vrsqrt.f32 %v1649_v6 }
 0x431   :  { %1739 = vst [vmem:[%s3612_s2 + $0x58] sm:$0xff] %v1707_v39  ;;  %2358 = vrsqrt.f32 %v1648_v5  ;;  %v1607_v47 = vpop.xlane.xlu1 %1606 }
 0x432   :  { %v2349_v3 = vpop.eup %2348  ;;  %1738 = vst [vmem:[%s3612_s2 + $0x50] sm:$0xff] %v1706_v41  ;;  %v1651_v52 = vmax.f32 %v1607_v47, 1e-24  ;;  %v1605_v0 = vpop.xlane.xlu0 %1604 }
 0x433   :  { %v2351_v40 = vpop.eup %2350  ;;  %v1709_v20 = vmul.f32 %v2349_v3, %v3383_v24  ;;  %v1650_v53 = vmax.f32 %v1605_v0, 1e-24 }
 0x434   :  { %v1708_v21 = vmul.f32 %v2351_v40, %v3386_v59  ;;  %2360 = vrsqrt.f32 %v1651_v52 }
 0x435   :  { %1741 = vst [vmem:[%s3612_s2 + $0x68] sm:$0xff] %v1709_v20  ;;  %2362 = vrsqrt.f32 %v1650_v53  ;;  %v1611_v46 = vpop.xlane.xlu1 %1610 }
 0x436   :  { %v2353_v34 = vpop.eup %2352  ;;  %1740 = vst [vmem:[%s3612_s2 + $0x60] sm:$0xff] %v1708_v21  ;;  %v1653_v35 = vmax.f32 %v1611_v46, 1e-24  ;;  %v1609_v44 = vpop.xlane.xlu0 %1608 }
 0x437   :  { %v2355_v49 = vpop.eup %2354  ;;  %v1711_v24 = vmul.f32 %v2353_v34, %v3393_v8  ;;  %v1652_v48 = vmax.f32 %v1609_v44, 1e-24 }
 0x438   :  { %v1710_v59 = vmul.f32 %v2355_v49, %v3396_v19  ;;  %2364 = vrsqrt.f32 %v1653_v35 }
 0x439   :  { %1743 = vst [vmem:[%s3612_s2 + $0x78] sm:$0xff] %v1711_v24  ;;  %2366 = vrsqrt.f32 %v1652_v48  ;;  %v1615_v50 = vpop.xlane.xlu1 %1614 }
 0x43a   :  { %v2357_v42 = vpop.eup %2356  ;;  %1742 = vst [vmem:[%s3612_s2 + $0x70] sm:$0xff] %v1710_v59  ;;  %v1655_v14 = vmax.f32 %v1615_v50, 1e-24  ;;  %v1613_v1 = vpop.xlane.xlu0 %1612 }
 0x43b   :  { %v2359_v10 = vpop.eup %2358  ;;  %v1713_v8 = vmul.f32 %v2357_v42, %v3403_v51  ;;  %v1654_v60 = vmax.f32 %v1613_v1, 1e-24 }
 0x43c   :  { %v1712_v19 = vmul.f32 %v2359_v10, %v3406_v26  ;;  %2368 = vrsqrt.f32 %v1655_v14 }
 0x43d   :  { %1745 = vst [vmem:[%s3612_s2 + $0x88] sm:$0xff] %v1713_v8  ;;  %2370 = vrsqrt.f32 %v1654_v60  ;;  %v1619_v7 = vpop.xlane.xlu1 %1618 }
 0x43e   :  { %v2361_v16 = vpop.eup %2360  ;;  %1744 = vst [vmem:[%s3612_s2 + $0x80] sm:$0xff] %v1712_v19  ;;  %v1657_v37 = vmax.f32 %v1619_v7, 1e-24  ;;  %v1617_v36 = vpop.xlane.xlu0 %1616 }
 0x43f   :  { %v2363_v30 = vpop.eup %2362  ;;  %v1715_v51 = vmul.f32 %v2361_v16, %v3413_v32  ;;  %v1656_v4 = vmax.f32 %v1617_v36, 1e-24 }
 0x440   :  { %v1714_v26 = vmul.f32 %v2363_v30, %v3416_v9  ;;  %2372 = vrsqrt.f32 %v1657_v37 }
 0x441   :  { %1747 = vst [vmem:[%s3612_s2 + $0x98] sm:$0xff] %v1715_v51  ;;  %2374 = vrsqrt.f32 %v1656_v4  ;;  %v1623_v25 = vpop.xlane.xlu1 %1622 }
 0x442   :  { %v2365_v62 = vpop.eup %2364  ;;  %1746 = vst [vmem:[%s3612_s2 + $0x90] sm:$0xff] %v1714_v26  ;;  %v1659_v58 = vmax.f32 %v1623_v25, 1e-24  ;;  %v1621_v23 = vpop.xlane.xlu0 %1620 }
 0x443   :  { %v2367_v12 = vpop.eup %2366  ;;  %v1717_v32 = vmul.f32 %v2365_v62, %v3423_v63  ;;  %v1658_v54 = vmax.f32 %v1621_v23, 1e-24 }
 0x444   :  { %v1716_v9 = vmul.f32 %v2367_v12, %v3426_v33  ;;  %2376 = vrsqrt.f32 %v1659_v58 }
 0x445   :  { %1749 = vst [vmem:[%s3612_s2 + $0xa8] sm:$0xff] %v1717_v32  ;;  %2378 = vrsqrt.f32 %v1658_v54  ;;  %v1627_v29 = vpop.xlane.xlu1 %1626 }
 0x446   :  { %v2369_v61 = vpop.eup %2368  ;;  %1748 = vst [vmem:[%s3612_s2 + $0xa0] sm:$0xff] %v1716_v9  ;;  %v1661_v27 = vmax.f32 %v1627_v29, 1e-24  ;;  %v1625_v31 = vpop.xlane.xlu0 %1624 }
 0x447   :  { %v2371_v56 = vpop.eup %2370  ;;  %v1719_v63 = vmul.f32 %v2369_v61, %v3433_v45  ;;  %v1660_v38 = vmax.f32 %v1625_v31, 1e-24 }
 0x448   :  { %v1718_v33 = vmul.f32 %v2371_v56, %v3436_v13  ;;  %2380 = vrsqrt.f32 %v1661_v27 }
 0x449   :  { %1751 = vst [vmem:[%s3612_s2 + $0xb8] sm:$0xff] %v1719_v63  ;;  %2382 = vrsqrt.f32 %v1660_v38  ;;  %v1631_v6 = vpop.xlane.xlu1 %1630 }
 0x44a   :  { %v2373_v15 = vpop.eup %2372  ;;  %1750 = vst [vmem:[%s3612_s2 + $0xb0] sm:$0xff] %v1718_v33  ;;  %v1663_v43 = vmax.f32 %v1631_v6, 1e-24  ;;  %v1629_v39 = vpop.xlane.xlu0 %1628 }
 0x44b   :  { %v2375_v5 = vpop.eup %2374  ;;  %v1721_v45 = vmul.f32 %v2373_v15, %v3443_v22  ;;  %v1662_v41 = vmax.f32 %v1629_v39, 1e-24 }
 0x44c   :  { %v1720_v13 = vmul.f32 %v2375_v5, %v3446_v55  ;;  %2384 = vrsqrt.f32 %v1663_v43 }
 0x44d   :  { %1753 = vst [vmem:[%s3612_s2 + $0xc8] sm:$0xff] %v1721_v45  ;;  %2386 = vrsqrt.f32 %v1662_v41 }
 0x44e   :  { %v2377_v47 = vpop.eup %2376  ;;  %1752 = vst [vmem:[%s3612_s2 + $0xc0] sm:$0xff] %v1720_v13 }
 0x44f   :  { %v2379_v3 = vpop.eup %2378  ;;  %v1723_v52 = vmul.f32 %v2377_v47, %v3453_v11 }
 0x450   :  { %v1722_v0 = vmul.f32 %v2379_v3, %v3456_v18 }
 0x451   :  { %1755 = vst [vmem:[%s3612_s2 + $0xd8] sm:$0xff] %v1723_v52 }
 0x452   :  { %v2381_v22 = vpop.eup %2380  ;;  %1754 = vst [vmem:[%s3612_s2 + $0xd0] sm:$0xff] %v1722_v0 }
 0x453   :  { %v2383_v55 = vpop.eup %2382  ;;  %v1725_v40 = vmul.f32 %v2381_v22, %v3463_v57 }
 0x454   :  { %v1724_v20 = vmul.f32 %v2383_v55, %v3466_v2 }
 0x455   :  { %1757 = vst [vmem:[%s3612_s2 + $0xe8] sm:$0xff] %v1725_v40 }
 0x456   :  { %v2385_v11 = vpop.eup %2384  ;;  %1756 = vst [vmem:[%s3612_s2 + $0xe0] sm:$0xff] %v1724_v20 }
 0x457   :  { %v2387_v18 = vpop.eup %2386  ;;  %v1727_v53 = vmul.f32 %v2385_v11, %v3473_v17 }
 0x458   :  { %v1726_v21 = vmul.f32 %v2387_v18, %v3476_v28 }
 0x459   :  { %1759 = vst [vmem:[%s3612_s2 + $0xf8] sm:$0xff] %v1727_v53 }
 0x45a   :  { %1758 = vst [vmem:[%s3612_s2 + $0xf0] sm:$0xff] %v1726_v21 }

</bundles_post_ra>
